<compile_context>
chip_gen: v5e
topology: v5e:2x2
jax: 0.10.0
libtpu: 0.0.40
codegen_flags: <defaults>
</compile_context>

<pallas_src>
import functools

import jax
import jax.numpy as jnp
from jax import lax
from jax.experimental import pallas as pl
from jax.experimental.pallas import tpu as pltpu

NUM_INPUTS = 784
NUM_HIDDEN = 300
NUM_OUTPUTS = 10

H_PAD = 384   # 300 -> 3 * 128 (lane-dense)
O_PAD = 128   # 10  -> 128     (lane-dense)


def _pick_row_tile(m, cap=512):
    """Largest multiple-of-8 tile <= cap that divides m (falls back to full m)."""
    for t in (cap, 256, 128, 64, 32, 16, 8):
        if t <= m and m % t == 0:
            return t
    return m


# --------------------------------------------------------------------------
# Phase 1: fc1 pre-pass. cur1_t = x_t @ W1 + b1 has no dependence on membrane
# state, so it is computed for ALL timesteps as one big [T*B, 784] @ [784, 384]
# matmul (MXU gets a large M instead of M=B on the serial critical path).
# --------------------------------------------------------------------------
def fc1_kernel(x_ref, w_ref, b_ref, o_ref):
    o_ref[...] = (
        jnp.dot(x_ref[...], w_ref[...], preferred_element_type=jnp.float32)
        + b_ref[...]
    )


def fc1_prepass(x_flat_bf16, w1_bf16, b1_f32):
    M = x_flat_bf16.shape[0]
    tm = _pick_row_tile(M)
    return pl.pallas_call(
        fc1_kernel,
        out_shape=jax.ShapeDtypeStruct((M, H_PAD), jnp.float32),
        grid_spec=pltpu.PrefetchScalarGridSpec(
            num_scalar_prefetch=0,
            grid=(M // tm,),
            in_specs=[
                pl.BlockSpec((tm, NUM_INPUTS), lambda m: (m, 0)),
                pl.BlockSpec((NUM_INPUTS, H_PAD), lambda m: (0, 0)),
                pl.BlockSpec((1, H_PAD), lambda m: (0, 0)),
            ],
            out_specs=pl.BlockSpec((tm, H_PAD), lambda m: (m, 0)),
        ),
        compiler_params=pltpu.CompilerParams(
            dimension_semantics=("parallel",)),   # independent rows -> megacore
    )(x_flat_bf16, w1_bf16, b1_f32)


# --------------------------------------------------------------------------
# Phase 2: sequential LIF recurrence.  One grid step == one time chunk of Tc
# steps; membrane state lives in VMEM scratch and is carried across grid steps.
# Only the LIF update and the tiny spk1 @ W2 matmul remain in the serial loop.
# --------------------------------------------------------------------------
def lif_kernel(cur1_ref, beta1_ref, th1_ref,
               w2_ref, b2_ref, beta2_ref, th2_ref,
               spk_out_ref, mem_out_ref,
               mem1_sc, mem2_sc, *, tc):
    c = pl.program_id(0)

    # init_leaky(): zero membrane potentials before the first time step
    @pl.when(c == 0)
    def _():
        mem1_sc[...] = jnp.zeros_like(mem1_sc)
        mem2_sc[...] = jnp.zeros_like(mem2_sc)

    # constants (beta already clipped in the wrapper — hoisted out of the loop)
    beta1 = beta1_ref[...]
    th1 = th1_ref[...]
    w2 = w2_ref[...]
    b2 = b2_ref[...]
    beta2 = beta2_ref[...]
    th2 = th2_ref[...]

    def step(s, carry):
        cur1 = cur1_ref[s]                                   # (B, H_PAD) f32

        # ---- lif1 (subtract reset, Heaviside forward) ----
        m1_prev = mem1_sc[...]
        reset1 = (m1_prev - th1 > 0.0).astype(jnp.float32)
        mem1 = beta1 * m1_prev + cur1 - reset1 * th1
        spk1 = (mem1 - th1 > 0.0).astype(jnp.float32)
        mem1_sc[...] = mem1

        # ---- fc2 + lif2 ----
        cur2 = jnp.dot(spk1.astype(jnp.bfloat16), w2,
                       preferred_element_type=jnp.float32) + b2
        m2_prev = mem2_sc[...]
        reset2 = (m2_prev - th2 > 0.0).astype(jnp.float32)
        mem2 = beta2 * m2_prev + cur2 - reset2 * th2
        spk2 = (mem2 - th2 > 0.0).astype(jnp.float32)
        mem2_sc[...] = mem2

        spk_out_ref[s] = spk2                                # spk2_rec[t]
        mem_out_ref[s] = mem2                                # mem2_rec[t]
        return carry

    lax.fori_loop(0, tc, step, 0, unroll=True)


def snn_forward(x, params, *, time_chunk=8):
    """x: [T, B, C, H, W] with C*H*W == 784. Returns (spk2_rec, mem2_rec), each [T, B, 10]."""
    T, B = x.shape[0], x.shape[1]
    w1, b1, beta1, th1, w2, b2, beta2, th2 = params

    # ---- glue (plain JAX): flatten, pad lane dims, clip beta once, bf16 MXU operands ----
    x_flat = x.reshape(T * B, NUM_INPUTS).astype(jnp.bfloat16)

    w1_p = jnp.zeros((NUM_INPUTS, H_PAD), jnp.bfloat16).at[:, :NUM_HIDDEN].set(
        w1.astype(jnp.bfloat16))
    b1_p = jnp.zeros((1, H_PAD), jnp.float32).at[:, :NUM_HIDDEN].set(b1)
    beta1_p = jnp.zeros((1, H_PAD), jnp.float32).at[:, :NUM_HIDDEN].set(
        jnp.clip(beta1, 0.0, 1.0))
    th1_p = jnp.ones((1, H_PAD), jnp.float32).at[:, :NUM_HIDDEN].set(th1)

    w2_p = jnp.zeros((H_PAD, O_PAD), jnp.bfloat16).at[:NUM_HIDDEN, :NUM_OUTPUTS].set(
        w2.astype(jnp.bfloat16))
    b2_p = jnp.zeros((1, O_PAD), jnp.float32).at[:, :NUM_OUTPUTS].set(b2)
    beta2_p = jnp.zeros((1, O_PAD), jnp.float32).at[:, :NUM_OUTPUTS].set(
        jnp.clip(beta2, 0.0, 1.0))
    th2_p = jnp.ones((1, O_PAD), jnp.float32).at[:, :NUM_OUTPUTS].set(th2)

    # ---- Phase 1: hoisted fc1 matmul over all T*B rows ----
    cur1_all = fc1_prepass(x_flat, w1_p, b1_p).reshape(T, B, H_PAD)

    # ---- Phase 2: LIF recurrence in time chunks ----
    tc = min(time_chunk, T)
    while T % tc:
        tc -= 1

    spk_pad, mem_pad = pl.pallas_call(
        functools.partial(lif_kernel, tc=tc),
        out_shape=[
            jax.ShapeDtypeStruct((T, B, O_PAD), jnp.float32),
            jax.ShapeDtypeStruct((T, B, O_PAD), jnp.float32),
        ],
        grid_spec=pltpu.PrefetchScalarGridSpec(
            num_scalar_prefetch=0,
            grid=(T // tc,),                     # sequential time recurrence
            in_specs=[
                pl.BlockSpec((tc, B, H_PAD), lambda c: (c, 0, 0)),  # cur1 chunk
                pl.BlockSpec((1, H_PAD), lambda c: (0, 0)),         # beta1
                pl.BlockSpec((1, H_PAD), lambda c: (0, 0)),         # thres1
                pl.BlockSpec((H_PAD, O_PAD), lambda c: (0, 0)),     # w2
                pl.BlockSpec((1, O_PAD), lambda c: (0, 0)),         # b2
                pl.BlockSpec((1, O_PAD), lambda c: (0, 0)),         # beta2
                pl.BlockSpec((1, O_PAD), lambda c: (0, 0)),         # thres2
            ],
            out_specs=[
                pl.BlockSpec((tc, B, O_PAD), lambda c: (c, 0, 0)),  # spk2_rec
                pl.BlockSpec((tc, B, O_PAD), lambda c: (c, 0, 0)),  # mem2_rec
            ],
            scratch_shapes=[
                pltpu.VMEM((B, H_PAD), jnp.float32),   # mem1 state
                pltpu.VMEM((B, O_PAD), jnp.float32),   # mem2 state
            ],
        ),
        compiler_params=pltpu.CompilerParams(
            dimension_semantics=("arbitrary",)),       # state carried across chunks
    )(cur1_all, beta1_p, th1_p, w2_p, b2_p, beta2_p, th2_p)

    # slice padded lanes back to the module's 10 outputs
    return spk_pad[:, :, :NUM_OUTPUTS], mem_pad[:, :, :NUM_OUTPUTS]


def init_params(key):
    """Deterministic synthetic parameters (shapes match the PyTorch module; W stored as [in, out])."""
    ks = jax.random.split(key, 6)
    lim1 = 1.0 / jnp.sqrt(jnp.float32(NUM_INPUTS))
    w1 = jax.random.uniform(ks[0], (NUM_INPUTS, NUM_HIDDEN), jnp.float32, -lim1, lim1)
    b1 = jax.random.uniform(ks[1], (1, NUM_HIDDEN), jnp.float32, -lim1, lim1)
    lim2 = 1.0 / jnp.sqrt(jnp.float32(NUM_HIDDEN))
    w2 = jax.random.uniform(ks[2], (NUM_HIDDEN, NUM_OUTPUTS), jnp.float32, -lim2, lim2)
    b2 = jax.random.uniform(ks[3], (1, NUM_OUTPUTS), jnp.float32, -lim2, lim2)
    # per-neuron decay / threshold (stand-in for decay_n_thres_matrix.csv)
    beta1 = jax.random.uniform(ks[4], (1, NUM_HIDDEN), jnp.float32, 0.7, 0.99)
    thres1 = jnp.ones((1, NUM_HIDDEN), jnp.float32)
    beta2 = jax.random.uniform(ks[5], (1, NUM_OUTPUTS), jnp.float32, 0.7, 0.99)
    thres2 = jnp.ones((1, NUM_OUTPUTS), jnp.float32)
    return (w1, b1, beta1, thres1, w2, b2, beta2, thres2)


if __name__ == "__main__":
    key = jax.random.PRNGKey(0)
    k_x, k_p = jax.random.split(key)

    T, B = 8, 8            # small time/batch (module default num_steps=200)
    x = jax.random.normal(k_x, (T, B, 1, 28, 28), dtype=jnp.float32)

    params = init_params(k_p)

    spk2_rec, mem2_rec = snn_forward(x, params)
    jax.block_until_ready((spk2_rec, mem2_rec))

    assert spk2_rec.shape == (T, B, NUM_OUTPUTS)
    assert mem2_rec.shape == (T, B, NUM_OUTPUTS)
    assert bool(jnp.all(jnp.isfinite(mem2_rec)))
    # spikes must be exactly 0/1
    assert bool(jnp.all((spk2_rec == 0.0) | (spk2_rec == 1.0)))
    print("KERNEL_OK")
</pallas_src>

<mosaic_0001>
module attributes {stable_mosaic.version = 11 : i64} {
  func.func @fc1_kernel(%arg0: i32, %arg1: memref<64x784xbf16, #tpu.memory_space<vmem>>, %arg2: memref<784x384xbf16, #tpu.memory_space<vmem>>, %arg3: memref<1x384xf32, #tpu.memory_space<vmem>>, %arg4: memref<64x384xf32, #tpu.memory_space<vmem>>) attributes {dimension_semantics = [#tpu.dimension_semantics<parallel>], iteration_bounds = array<i64: 1>, scalar_prefetch = 0 : i64, scratch_operands = 0 : i64, tpu.core_type = #tpu.core_type<tc>, window_params = [{transform_indices = @transform_0, window_bounds = array<i64: 64, 784>}, {pipeline_mode = #tpu.pipeline_mode<synchronous>, transform_indices = @transform_1, window_bounds = array<i64: 784, 384>}, {pipeline_mode = #tpu.pipeline_mode<synchronous>, transform_indices = @transform_2, window_bounds = array<i64: 1, 384>}, {transform_indices = @transform_3, window_bounds = array<i64: 64, 384>}]} {
    %c0 = arith.constant 0 : index
    %c0_0 = arith.constant 0 : index
    %0 = vector.load %arg1[%c0, %c0_0] : memref<64x784xbf16, #tpu.memory_space<vmem>>, vector<64x784xbf16>
    %c0_1 = arith.constant 0 : index
    %c0_2 = arith.constant 0 : index
    %1 = vector.load %arg2[%c0_1, %c0_2] : memref<784x384xbf16, #tpu.memory_space<vmem>>, vector<784x384xbf16>
    %cst = arith.constant dense<0.000000e+00> : vector<64x384xf32>
    %2 = tpu.matmul %0, %1, %cst {dimension_numbers = #tpu.dot_dimension_numbers<[1], [0], [0], [1], [0, 0, 1, 1], [], []>} : vector<64x784xbf16>, vector<784x384xbf16>, vector<64x384xf32> -> vector<64x384xf32>
    %c0_3 = arith.constant 0 : index
    %c0_4 = arith.constant 0 : index
    %3 = vector.load %arg3[%c0_3, %c0_4] : memref<1x384xf32, #tpu.memory_space<vmem>>, vector<1x384xf32>
    %4 = vector.broadcast %3 : vector<1x384xf32> to vector<64x384xf32>
    %5 = arith.addf %2, %4 : vector<64x384xf32>
    %c0_5 = arith.constant 0 : index
    %c0_6 = arith.constant 0 : index
    %6 = vector.load %arg4[%c0_5, %c0_6] : memref<64x384xf32, #tpu.memory_space<vmem>>, vector<64x384xf32>
    tpu.vector_store %arg4[%c0_5, %c0_6], %5 {strides = array<i32>} : memref<64x384xf32, #tpu.memory_space<vmem>>, vector<64x384xf32>,
    return
  }
  func.func @transform_0(%arg0: i32) -> (i32, i32) {
    %c0_i32 = arith.constant 0 : i32
    %c0_i32_0 = arith.constant 0 : i32
    return %arg0, %c0_i32 : i32, i32
  }
  func.func @transform_1(%arg0: i32) -> (i32, i32) {
    %c0_i32 = arith.constant 0 : i32
    %c0_i32_0 = arith.constant 0 : i32
    %c0_i32_1 = arith.constant 0 : i32
    return %c0_i32, %c0_i32_0 : i32, i32
  }
  func.func @transform_2(%arg0: i32) -> (i32, i32) {
    %c0_i32 = arith.constant 0 : i32
    %c0_i32_0 = arith.constant 0 : i32
    %c0_i32_1 = arith.constant 0 : i32
    return %c0_i32, %c0_i32_0 : i32, i32
  }
  func.func @transform_3(%arg0: i32) -> (i32, i32) {
    %c0_i32 = arith.constant 0 : i32
    %c0_i32_0 = arith.constant 0 : i32
    return %arg0, %c0_i32 : i32, i32
  }
}

</mosaic_0001>

<bundles_post_ra>
// kernel: tpu_custom_call.1
= control target key start
LH: loop header
LB: loop body
LE: loop exit
PB: predicated region body
PF: predicated region fallthrough
CT: control target
= control target key end

     0   :  { %8 = vsyncpa [#allocation3], 0  ;;  %s3404_s0 = inlined_call_operand.hbm [shape: bf16[64,784], index: 0, kind: input, shape index: {}]   ;;  %s3405_s1 = inlined_call_operand.hbm [shape: bf16[784,384], index: 1, kind: input, shape index: {}]   ;;  %s3406_s2 = inlined_call_operand.hbm [shape: f32[1,384], index: 2, kind: input, shape index: {}]   ;;  %s3407_s3 = inlined_call_operand.hbm [shape: f32[64,384], index: 3, kind: output, shape index: {}]  }
   0x1   :  { %9 = vsyncpa [#allocation6], 0  ;;  %s28_s14 = sshll.u32 %s3405_s1, 4  ;;  %s29_s14 = int_to_ptr.hbm [resolvable:$true] %s28_s14 }
   0x2   :  { %10 = vsyncpa [#allocation4], 0  ;;  %s2902_s15 = smov [#allocation5]   ;;  %s15_s19 = sshll.u32 %s3404_s0, 4  ;;  %s16_s19 = int_to_ptr.hbm [resolvable:$true] %s15_s19 }
   0x3   :  { %s30_s16 = sshll.u32 %s2902_s15, 4  ;;  %s2903_s20 = smov 192   ;;  %s31_s16 = int_to_ptr.vmem [resolvable:$true] %s30_s16 }
   0x4   :  { %s2904_s21 = smov 12   ;;  %s2905_s22 = smov [#allocation2]  }
   0x5   :  { %36 = dma.hbm_to_vmem [thread:$0]  %s29_s14, 18816, %s31_s16, [#allocation6], %s2903_s20, %s2903_s20, %s2904_s21  }
   0x6   :  { %s17_s23 = sshll.u32 %s2905_s22, 4  ;;  %s2906_s24 = smov 448   ;;  %s18_s23 = int_to_ptr.vmem [resolvable:$true] %s17_s23 }
   0x7   :  { %s2907_s25 = smov 28   ;;  %s42_s27 = sshll.u32 %s3406_s2, 4  ;;  %s43_s27 = int_to_ptr.hbm [resolvable:$true] %s42_s27 }
   0x8   :  { %23 = dma.hbm_to_vmem [thread:$0]  %s16_s19, 3584, %s18_s23, [#allocation3], %s2906_s24, %s2906_s24, %s2907_s25  }
   0x9   :  { %s2908_s28 = smov [#allocation7]  }
   0xa   :  { %s44_s29 = sshll.u32 %s2908_s28, 4  ;;  %s45_s29 = int_to_ptr.vmem [resolvable:$true] %s44_s29 }
   0xb   :  { %47 = dma.hbm_to_vmem [thread:$0]  %s43_s27, 48, %s45_s29, [#allocation6]  }
   0xc   :  { %2896 = dma.done.wait [#allocation3], 3584  }
   0xd   :  { %2897 = vsyncadd [#allocation3], 4294963712 }
   0xe   :  { %2898 = dma.done.wait [#allocation6], 18864  }
   0xf   :  { %2899 = vsyncadd [#allocation6], 4294948432  ;;  %v2085_v0 = vld [vmem:[#allocation5 + $0xa8] sm:$0xf]  ;;  %v2649_v1 = vld [vmem:[#allocation5 + $0xb0] sm:$0xf0] }
  0x10   :  { %v2073_v2 = vld [vmem:[#allocation5 + $0x90] sm:$0xf]  ;;  %v2086_v3 = vor.u32 %v2649_v1, %v2085_v0  ;;  %v2646_v4 = vld [vmem:[#allocation5 + $0x98] sm:$0xf0]  ;;  %v2277_v5 = vld [vmem:[#allocation5 + $0x228] sm:$0xf] }
  0x11   :  { %v2697_v6 = vld [vmem:[#allocation5 + $0x230] sm:$0xf0]  ;;  %v2265_v8 = vld [vmem:[#allocation5 + $0x210] sm:$0xf]  ;;  %v2074_v9 = vor.u32 %v2646_v4, %v2073_v2  ;;  %v2694_v10 = vld [vmem:[#allocation5 + $0x218] sm:$0xf0] }
  0x12   :  { %v2278_v7 = vor.u32 %v2697_v6, %v2277_v5  ;;  %2774 = vmatpush.bf16.msra.mxu1 %v2086_v3  ;;  %1234 = vmatpush.bf16.msra.mxu0 %v2086_v3  ;;  %v2061_v11 = vld [vmem:[#allocation5 + $0x78] sm:$0xf]  ;;  %v2643_v12 = vld [vmem:[#allocation5 + $0x80] sm:$0xf0]  ;;  %v2266_v13 = vor.u32 %v2694_v10, %v2265_v8  ;;  %v2373_v17 = vld [vmem:[#allocation5 + $0x2e8] sm:$0xf] }
  0x13   :  { %v2253_v14 = vld [vmem:[#allocation5 + $0x1f8] sm:$0xf]  ;;  %v2691_v15 = vld [vmem:[#allocation5 + $0x200] sm:$0xf0]  ;;  %v2062_v16 = vor.u32 %v2643_v12, %v2061_v11  ;;  %v2721_v18 = vld [vmem:[#allocation5 + $0x2f0] sm:$0xf0] }
  0x14   :  { %1292 = vmatpush.bf16.msra.mxu2 %v2278_v7  ;;  %v2049_v19 = vld [vmem:[#allocation5 + $0x60] sm:$0xf]  ;;  %v2640_v20 = vld [vmem:[#allocation5 + $0x68] sm:$0xf0]  ;;  %v2254_v21 = vor.u32 %v2691_v15, %v2253_v14  ;;  %v2374_v23 = vor.u32 %v2721_v18, %v2373_v17  ;;  %v2361_v25 = vld [vmem:[#allocation5 + $0x2d0] sm:$0xf] }
  0x15   :  { %v2241_v22 = vld [vmem:[#allocation5 + $0x1e0] sm:$0xf]  ;;  %v2688_v24 = vld [vmem:[#allocation5 + $0x1e8] sm:$0xf0]  ;;  %v2718_v26 = vld [vmem:[#allocation5 + $0x2d8] sm:$0xf0]  ;;  %v2050_v28 = vor.u32 %v2640_v20, %v2049_v19 }
  0x16   :  { %2775 = vmatpush.bf16.msra.mxu1 %v2074_v9  ;;  %1235 = vmatpush.bf16.msra.mxu0 %v2074_v9  ;;  %v2362_v27 = vor.u32 %v2718_v26, %v2361_v25  ;;  %v2349_v29 = vld [vmem:[#allocation5 + $0x2b8] sm:$0xf]  ;;  %v2715_v30 = vld [vmem:[#allocation5 + $0x2c0] sm:$0xf0]  ;;  %v2037_v31 = vld [vmem:[#allocation5 + $0x48] sm:$0xf]  ;;  %v2242_v33 = vor.u32 %v2688_v24, %v2241_v22 }
  0x17   :  { %1321 = vmatpush.bf16.msra.mxu3 %v2374_v23  ;;  %v2637_v32 = vld [vmem:[#allocation5 + $0x50] sm:$0xf0]  ;;  %v2229_v34 = vld [vmem:[#allocation5 + $0x1c8] sm:$0xf]  ;;  %v2350_v36 = vor.u32 %v2715_v30, %v2349_v29  ;;  %v2337_v38 = vld [vmem:[#allocation5 + $0x2a0] sm:$0xf] }
  0x18   :  { %1293 = vmatpush.bf16.msra.mxu2 %v2266_v13  ;;  %v2685_v35 = vld [vmem:[#allocation5 + $0x1d0] sm:$0xf0]  ;;  %v2038_v37 = vor.u32 %v2637_v32, %v2037_v31  ;;  %v2712_v39 = vld [vmem:[#allocation5 + $0x2a8] sm:$0xf0]  ;;  %v2025_v40 = vld [vmem:[#allocation5 + $0x30] sm:$0xf] }
  0x19   :  { %v2634_v41 = vld [vmem:[#allocation5 + $0x38] sm:$0xf0]  ;;  %v2230_v42 = vor.u32 %v2685_v35, %v2229_v34  ;;  %v2217_v43 = vld [vmem:[#allocation5 + $0x1b0] sm:$0xf]  ;;  %v2338_v45 = vor.u32 %v2712_v39, %v2337_v38  ;;  %v2325_v47 = vld [vmem:[#allocation5 + $0x288] sm:$0xf] }
  0x1a   :  { %2776 = vmatpush.bf16.msra.mxu1 %v2062_v16  ;;  %1236 = vmatpush.bf16.msra.mxu0 %v2062_v16  ;;  %v2682_v44 = vld [vmem:[#allocation5 + $0x1b8] sm:$0xf0]  ;;  %v2026_v46 = vor.u32 %v2634_v41, %v2025_v40  ;;  %v2709_v48 = vld [vmem:[#allocation5 + $0x290] sm:$0xf0]  ;;  %v2013_v49 = vld [vmem:[#allocation5 + $0x18] sm:$0xf] }
  0x1b   :  { %1322 = vmatpush.bf16.msra.mxu3 %v2362_v27  ;;  %v2631_v50 = vld [vmem:[#allocation5 + $0x20] sm:$0xf0]  ;;  %v2218_v51 = vor.u32 %v2682_v44, %v2217_v43  ;;  %v2205_v52 = vld [vmem:[#allocation5 + $0x198] sm:$0xf]  ;;  %v2326_v54 = vor.u32 %v2709_v48, %v2325_v47  ;;  %v2313_v56 = vld [vmem:[#allocation5 + $0x270] sm:$0xf] }
  0x1c   :  { %1294 = vmatpush.bf16.msra.mxu2 %v2254_v21  ;;  %v2679_v53 = vld [vmem:[#allocation5 + $0x1a0] sm:$0xf0]  ;;  %v2014_v55 = vor.u32 %v2631_v50, %v2013_v49  ;;  %v2706_v57 = vld [vmem:[#allocation5 + $0x278] sm:$0xf0]  ;;  %v2001_v58 = vld [vmem:[#allocation5] sm:$0xf] }
  0x1d   :  { %v2628_v59 = vld [vmem:[#allocation5 + $0x8] sm:$0xf0]  ;;  %v2206_v60 = vor.u32 %v2679_v53, %v2205_v52  ;;  %v2181_v61 = vld [vmem:[#allocation5 + $0x168] sm:$0xf]  ;;  %v1945_v62 = vld [vmem:[#allocation2 + $0x70] sm:$0xf]  ;;  %v2314_v5 = vor.u32 %v2706_v57, %v2313_v56 }
  0x1e   :  { %2777 = vmatpush.bf16.msra.mxu1 %v2050_v28  ;;  %1237 = vmatpush.bf16.msra.mxu0 %v2050_v28  ;;  %v2673_v63 = vld [vmem:[#allocation5 + $0x170] sm:$0xf0]  ;;  %v2193_v0 = vld [vmem:[#allocation5 + $0x180] sm:$0xf]  ;;  %v2676_v1 = vld [vmem:[#allocation5 + $0x188] sm:$0xf0]  ;;  %v2002_v6 = vor.u32 %v2628_v59, %v2001_v58 }
  0x1f   :  { %1323 = vmatpush.bf16.msra.mxu3 %v2350_v36  ;;  %v2616_v2 = vld [vmem:[#allocation2 + $0x88] sm:$0xf0]  ;;  %v2469_v3 = vld [vmem:[#allocation5 + $0x3a8] sm:$0xf]  ;;  %v2745_v4 = vld [vmem:[#allocation5 + $0x3b0] sm:$0xf0]  ;;  %v2182_v10 = vor.u32 %v2673_v63, %v2181_v61  ;;  %v2194_v11 = vor.u32 %v2676_v1, %v2193_v0 }
  0x20   :  { %1295 = vmatpush.bf16.msra.mxu2 %v2242_v33  ;;  %v1897_v7 = vld [vmem:[#allocation2 + $0x8] sm:$0xf]  ;;  %v1889_v8 = vld [vmem:[#allocation2] sm:$0xf]  ;;  %v2602_v9 = vld [vmem:[#allocation2 + $0x18] sm:$0xf0]  ;;  %v2470_v17 = vor.u32 %v2745_v4, %v2469_v3  ;;  %v2941_v18 = vor.u32 %v2616_v2, %v1945_v62 }
  0x21   :  { %v2603_v12 = vld [vmem:[#allocation2 + $0x20] sm:$0xf0]  ;;  %v2301_v13 = vld [vmem:[#allocation5 + $0x258] sm:$0xf]  ;;  %v2169_v15 = vld [vmem:[#allocation5 + $0x150] sm:$0xf]  ;;  %v2943_v19 = vor.u32 %v2602_v9, %v1889_v8 }
  0x22   :  { %2778 = vmatpush.bf16.msra.mxu1 %v2038_v37  ;;  %1238 = vmatpush.bf16.msra.mxu0 %v2038_v37  ;;  %v2703_v14 = vld [vmem:[#allocation5 + $0x260] sm:$0xf0]  ;;  %v2670_v16 = vld [vmem:[#allocation5 + $0x158] sm:$0xf0]  ;;  %v2457_v20 = vld [vmem:[#allocation5 + $0x390] sm:$0xf]  ;;  %v2945_v22 = vor.u32 %v2603_v12, %v1897_v7 }
  0x23   :  { %1324 = vmatpush.bf16.msra.mxu3 %v2338_v45  ;;  %v2742_v21 = vld [vmem:[#allocation5 + $0x398] sm:$0xf0]  ;;  %v2302_v23 = vor.u32 %v2703_v14, %v2301_v13  ;;  %v2170_v24 = vor.u32 %v2670_v16, %v2169_v15  ;;  %v2157_v25 = vld [vmem:[#allocation5 + $0x138] sm:$0xf]  ;;  %v2289_v26 = vld [vmem:[#allocation5 + $0x240] sm:$0xf] }
  0x24   :  { %1296 = vmatpush.bf16.msra.mxu2 %v2230_v42  ;;  %v2700_v27 = vld [vmem:[#allocation5 + $0x248] sm:$0xf0]  ;;  %v2667_v28 = vld [vmem:[#allocation5 + $0x140] sm:$0xf0]  ;;  %v2458_v29 = vor.u32 %v2742_v21, %v2457_v20  ;;  %v2087_v31 = vld [vmem:[#allocation5 + $0xb4] sm:$0xf0] }
  0x25   :  { %v2648_v30 = vld [vmem:[#allocation5 + $0xac] sm:$0xf]  ;;  %v2445_v32 = vld [vmem:[#allocation5 + $0x378] sm:$0xf]  ;;  %v2739_v33 = vld [vmem:[#allocation5 + $0x380] sm:$0xf0]  ;;  %v2290_v34 = vor.u32 %v2700_v27, %v2289_v26  ;;  %v2158_v37 = vor.u32 %v2667_v28, %v2157_v25 }
  0x26   :  { %2779 = vmatpush.bf16.msra.mxu1 %v2026_v46  ;;  %1239 = vmatpush.bf16.msra.mxu0 %v2026_v46  ;;  %v2600_v35 = vld [vmem:[#allocation2 + $0xc] sm:$0xf]  ;;  %v1899_v36 = vld [vmem:[#allocation2 + $0x24] sm:$0xf0]  ;;  %v2145_v38 = vld [vmem:[#allocation5 + $0x120] sm:$0xf]  ;;  %v2090_v39 = vor.u32 %v2648_v30, %v2087_v31  ;;  %v2446_v41 = vor.u32 %v2739_v33, %v2445_v32 }
  0x27   :  { %1325 = vmatpush.bf16.msra.mxu3 %v2326_v54  ;;  %v2664_v40 = vld [vmem:[#allocation5 + $0x128] sm:$0xf0]  ;;  %v2645_v42 = vld [vmem:[#allocation5 + $0x94] sm:$0xf]  ;;  %v2075_v43 = vld [vmem:[#allocation5 + $0x9c] sm:$0xf0]  ;;  %v2950_v46 = vor.u32 %v2600_v35, %v1899_v36 }
  0x28   :  { %1297 = vmatpush.bf16.msra.mxu2 %v2218_v51  ;;  %v2433_v44 = vld [vmem:[#allocation5 + $0x360] sm:$0xf]  ;;  %v2736_v45 = vld [vmem:[#allocation5 + $0x368] sm:$0xf0]  ;;  %v2146_v47 = vor.u32 %v2664_v40, %v2145_v38  ;;  %v2133_v48 = vld [vmem:[#allocation5 + $0x108] sm:$0xf]  ;;  %v2078_v49 = vor.u32 %v2645_v42, %v2075_v43 }
  0x29   :  { %3418 = vst [vmem:[#allocation12_spill] sm:$0xff] %v2950_v46  ;;  %v2661_v50 = vld [vmem:[#allocation5 + $0x110] sm:$0xf0]  ;;  %v2434_v51 = vor.u32 %v2736_v45, %v2433_v44  ;;  %v2642_v52 = vld [vmem:[#allocation5 + $0x7c] sm:$0xf]  ;;  %vm1221_vm0 = vcmask 130048  }
  0x2a   :  { %2780 = vmatpush.bf16.msra.mxu1 %v2014_v55  ;;  %1240 = vmatpush.bf16.msra.mxu0 %v2014_v55  ;;  %v2063_v53 = vld [vmem:[#allocation5 + $0x84] sm:$0xf0]  ;;  %v2733_v56 = vld [vmem:[#allocation5 + $0x350] sm:$0xf0]  ;;  %v2623_v57 = vld [vmem:[#allocation2 + $0xc0] sm:$0xf0] }
  0x2b   :  { %1326 = vmatpush.bf16.msra.mxu3 %v2314_v5  ;;  %v1973_v54 = vld [vmem:[#allocation2 + $0xa8] sm:$0xf]  ;;  %v1917_v58 = vld [vmem:[#allocation2 + $0x38] sm:$0xf]  ;;  %v2609_v59 = vld [vmem:[#allocation2 + $0x50] sm:$0xf0]  ;;  %v2066_v63 = vor.u32 %v2642_v52, %v2063_v53 }
  0x2c   :  { %1298 = vmatpush.bf16.msra.mxu2 %v2206_v60  ;;  %v2421_v55 = vld [vmem:[#allocation5 + $0x348] sm:$0xf]  ;;  %v2134_v60 = vor.u32 %v2661_v50, %v2133_v48  ;;  %v1925_v61 = vld [vmem:[#allocation2 + $0x40] sm:$0xf]  ;;  %v2610_v62 = vld [vmem:[#allocation2 + $0x58] sm:$0xf0]  ;;  %v2953_v3 = vor.u32 %v2623_v57, %v1973_v54  ;;  %v2955_v4 = vor.u32 %v2609_v59, %v1917_v58 }
  0x2d   :  { %v2121_v0 = vld [vmem:[#allocation5 + $0xf0] sm:$0xf]  ;;  %v2658_v1 = vld [vmem:[#allocation5 + $0xf8] sm:$0xf0]  ;;  %v2422_v2 = vor.u32 %v2733_v56, %v2421_v55  ;;  %v2957_v7 = vor.u32 %v2610_v62, %v1925_v61  ;;  %v2109_v9 = vld [vmem:[#allocation5 + $0xd8] sm:$0xf] }
  0x2e   :  { %2781 = vmatpush.bf16.msra.mxu1 %v2002_v6  ;;  %1241 = vmatpush.bf16.msra.mxu0 %v2002_v6  ;;  %v2409_v5 = vld [vmem:[#allocation5 + $0x330] sm:$0xf]  ;;  %v2730_v6 = vld [vmem:[#allocation5 + $0x338] sm:$0xf0]  ;;  %v2122_v8 = vor.u32 %v2658_v1, %v2121_v0  ;;  %v2397_v12 = vld [vmem:[#allocation5 + $0x318] sm:$0xf] }
  0x2f   :  { %1327 = vmatpush.bf16.msra.mxu3 %v2302_v23  ;;  %v2727_v13 = vld [vmem:[#allocation5 + $0x320] sm:$0xf0]  ;;  %v1927_v15 = vld [vmem:[#allocation2 + $0x5c] sm:$0xf0]  ;;  %v2652_v20 = vld [vmem:[#allocation5 + $0xc8] sm:$0xf0] }
  0x30   :  { %1299 = vmatpush.bf16.msra.mxu2 %v2194_v11  ;;  %v2410_v11 = vor.u32 %v2730_v6, %v2409_v5  ;;  %v2607_v14 = vld [vmem:[#allocation2 + $0x44] sm:$0xf]  ;;  %v2398_v23 = vor.u32 %v2727_v13, %v2397_v12  ;;  %v2769_v25 = vld [vmem:[#allocation5 + $0x470] sm:$0xf0]  ;;  %v2051_v26 = vld [vmem:[#allocation5 + $0x6c] sm:$0xf0] }
  0x31   :  { %1252 = vmatmul.bf16.vlgmr.msra.gmra.mxu1 %v2941_v18  ;;  %1242 = vmatmul.bf16.vlgmr.msra.gmra.mxu0 %v2943_v19  ;;  %v2639_v21 = vld [vmem:[#allocation5 + $0x64] sm:$0xf]  ;;  %v2385_v27 = vld [vmem:[#allocation5 + $0x300] sm:$0xf]  ;;  %v2724_v28 = vld [vmem:[#allocation5 + $0x308] sm:$0xf0] }
  0x32   :  { %1263 = vmatpush.bf16.msrb.mxu1 %v2182_v10  ;;  %1350 = vmatpush.bf16.msrb.mxu0 %v2470_v17  ;;  %v2655_v10 = vld [vmem:[#allocation5 + $0xe0] sm:$0xf0]  ;;  %v2054_v30 = vor.u32 %v2639_v21, %v2051_v26  ;;  %v2672_v31 = vld [vmem:[#allocation5 + $0x16c] sm:$0xf]  ;;  %v2183_v32 = vld [vmem:[#allocation5 + $0x174] sm:$0xf0] }
  0x33   :  { %1300 = vmatmul.bf16.vlgmr.msra.gmra.mxu2 %v2945_v22  ;;  %1328 = vmatpush.bf16.msra.mxu3 %v2290_v34  ;;  %v2110_v16 = vor.u32 %v2655_v10, %v2109_v9  ;;  %v2636_v33 = vld [vmem:[#allocation5 + $0x4c] sm:$0xf]  ;;  %v2039_v34 = vld [vmem:[#allocation5 + $0x54] sm:$0xf0]  ;;  %v1891_v40 = vld [vmem:[#allocation2 + $0x1c] sm:$0xf0]  ;;  %v2186_v43 = vor.u32 %v2672_v31, %v2183_v32 }
  0x34   :  { %2782 = vmatpush.bf16.msrb.mxu2 %v2470_v17  ;;  %v2097_v17 = vld [vmem:[#allocation5 + $0xc0] sm:$0xf]  ;;  %v2042_v36 = vor.u32 %v2636_v33, %v2039_v34  ;;  %v2766_v42 = vld [vmem:[#allocation5 + $0x458] sm:$0xf0]  ;;  %v1953_v44 = vld [vmem:[#allocation2 + $0x78] sm:$0xf] }
  0x35   :  { %v2098_v35 = vor.u32 %v2652_v20, %v2097_v17  ;;  %v1905_v45 = vld [vmem:[#allocation2 + $0x10] sm:$0xf]  ;;  %v2617_v48 = vld [vmem:[#allocation2 + $0x90] sm:$0xf0]  ;;  %v2171_v50 = vld [vmem:[#allocation5 + $0x15c] sm:$0xf0] }
  0x36   :  { %1264 = vmatpush.bf16.msrb.mxu1 %v2170_v24  ;;  %1351 = vmatpush.bf16.msrb.mxu0 %v2458_v29  ;;  %v2565_v24 = vld [vmem:[#allocation5 + $0x468] sm:$0xf]  ;;  %v2541_v54 = vld [vmem:[#allocation5 + $0x438] sm:$0xf]  ;;  %v2763_v55 = vld [vmem:[#allocation5 + $0x440] sm:$0xf0]  ;;  %v2969_v56 = vor.u32 %v2617_v48, %v1953_v44 }
  0x37   :  { %1437 = vmatpush.bf16.msrb.mxu3 %v2090_v39  ;;  %v2566_v38 = vor.u32 %v2769_v25, %v2565_v24  ;;  %v2386_v39 = vor.u32 %v2724_v28, %v2385_v27  ;;  %v2542_v58 = vor.u32 %v2763_v55, %v2541_v54  ;;  %v2529_v59 = vld [vmem:[#allocation5 + $0x420] sm:$0xf]  ;;  %v2666_v61 = vld [vmem:[#allocation5 + $0x13c] sm:$0xf]  ;;  %v2159_v0 = vld [vmem:[#allocation5 + $0x144] sm:$0xf0] }
  0x38   :  { %2783 = vmatpush.bf16.msrb.mxu2 %v2458_v29  ;;  %1329 = vmatmul.bf16.vlgmr.msra.gmra.mxu3 %v2950_v46  ;;  %v2962_v29 = vor.u32 %v2607_v14, %v1927_v15  ;;  %v2614_v62 = vld [vmem:[#allocation2 + $0x7c] sm:$0xf]  ;;  %v2162_v1 = vor.u32 %v2666_v61, %v2159_v0  ;;  %v2633_v5 = vld [vmem:[#allocation5 + $0x34] sm:$0xf]  ;;  %v2027_v6 = vld [vmem:[#allocation5 + $0x3c] sm:$0xf0] }
  0x39   :  { %v2517_v9 = vld [vmem:[#allocation5 + $0x408] sm:$0xf]  ;;  %v2757_v10 = vld [vmem:[#allocation5 + $0x410] sm:$0xf0]  ;;  %v2663_v12 = vld [vmem:[#allocation5 + $0x124] sm:$0xf] }
  0x3a   :  { %1265 = vmatpush.bf16.msrb.mxu1 %v2158_v37  ;;  %1352 = vmatpush.bf16.msrb.mxu0 %v2446_v41  ;;  %3419 = vst [vmem:[#allocation13_spill] sm:$0xff] %v2962_v29  ;;  %v2599_v37 = vld [vmem:[#allocation2 + $0x4] sm:$0xf]  ;;  %v2147_v13 = vld [vmem:[#allocation5 + $0x12c] sm:$0xf0]  ;;  %v2518_v24 = vor.u32 %v2757_v10, %v2517_v9  ;;  %s2909_s0 = smov [#allocation8]  }
  0x3b   :  { %1438 = vmatpush.bf16.msrb.mxu3 %v2078_v49  ;;  %v2669_v49 = vld [vmem:[#allocation5 + $0x154] sm:$0xf]  ;;  %v2965_v52 = vor.u32 %v2599_v37, %v1891_v40  ;;  %v2577_v14 = vld [vmem:[#allocation5 + $0x480] sm:$0xf]  ;;  %v2772_v15 = vld [vmem:[#allocation5 + $0x488] sm:$0xf0] }
  0x3c   :  { %2784 = vmatpush.bf16.msrb.mxu2 %v2446_v41  ;;  %v2553_v41 = vld [vmem:[#allocation5 + $0x450] sm:$0xf]  ;;  %v2174_v57 = vor.u32 %v2669_v49, %v2171_v50  ;;  %v2578_v17 = vor.u32 %v2772_v15, %v2577_v14  ;;  %v2630_v20 = vld [vmem:[#allocation5 + $0x1c] sm:$0xf]  ;;  %v2015_v21 = vld [vmem:[#allocation5 + $0x24] sm:$0xf0] }
  0x3d   :  { %v2018_v25 = vor.u32 %v2630_v20, %v2015_v21  ;;  %v2135_v26 = vld [vmem:[#allocation5 + $0x114] sm:$0xf0]  ;;  %v2606_v27 = vld [vmem:[#allocation2 + $0x3c] sm:$0xf]  ;;  %v2505_v28 = vld [vmem:[#allocation5 + $0x3f0] sm:$0xf] }
  0x3e   :  { %1266 = vmatpush.bf16.msrb.mxu1 %v2146_v47  ;;  %1353 = vmatpush.bf16.msrb.mxu0 %v2434_v51  ;;  %v2604_v47 = vld [vmem:[#allocation2 + $0x28] sm:$0xf0]  ;;  %v1919_v31 = vld [vmem:[#allocation2 + $0x54] sm:$0xf0]  ;;  %v1933_v32 = vld [vmem:[#allocation2 + $0x48] sm:$0xf] }
  0x3f   :  { %1439 = vmatpush.bf16.msrb.mxu3 %v2066_v63  ;;  %v2967_v53 = vor.u32 %v2604_v47, %v1905_v45  ;;  %v1955_v63 = vld [vmem:[#allocation2 + $0x94] sm:$0xf0]  ;;  %v2611_v33 = vld [vmem:[#allocation2 + $0x60] sm:$0xf0]  ;;  %v2003_v48 = vld [vmem:[#allocation5 + $0xc] sm:$0xf0] }
  0x40   :  { %2785 = vmatpush.bf16.msrb.mxu2 %v2434_v51  ;;  %v2554_v51 = vor.u32 %v2766_v42, %v2553_v41  ;;  %v2621_v41 = vld [vmem:[#allocation2 + $0xb4] sm:$0xf]  ;;  %v1983_v42 = vld [vmem:[#allocation2 + $0xcc] sm:$0xf0]  ;;  %v2751_v44 = vld [vmem:[#allocation5 + $0x3e0] sm:$0xf0] }
  0x41   :  { %1257 = vmatmul.bf16.gmra.mxu1 %v2953_v3  ;;  %1247 = vmatmul.bf16.gmra.mxu0 %v2955_v4  ;;  %v2627_v45 = vld [vmem:[#allocation5 + $0x4] sm:$0xf]  ;;  %v2657_v49 = vld [vmem:[#allocation5 + $0xf4] sm:$0xf]  ;;  %v2123_v50 = vld [vmem:[#allocation5 + $0xfc] sm:$0xf0] }
  0x42   :  { %1267 = vmatpush.bf16.msrb.mxu1 %v2134_v60  ;;  %1354 = vmatpush.bf16.msrb.mxu0 %v2422_v2  ;;  %v2760_v60 = vld [vmem:[#allocation5 + $0x428] sm:$0xf0]  ;;  %v2126_v54 = vor.u32 %v2657_v49, %v2123_v50  ;;  %v2654_v55 = vld [vmem:[#allocation5 + $0xdc] sm:$0xf]  ;;  %v2099_v0 = vld [vmem:[#allocation5 + $0xcc] sm:$0xf0] }
  0x43   :  { %1305 = vmatmul.bf16.gmra.mxu2 %v2957_v7  ;;  %1440 = vmatpush.bf16.msrb.mxu3 %v2054_v30  ;;  %v2754_v30 = vld [vmem:[#allocation5 + $0x3f8] sm:$0xf0]  ;;  %v2748_v61 = vld [vmem:[#allocation5 + $0x3c8] sm:$0xf0]  ;;  %v1947_v10 = vld [vmem:[#allocation2 + $0x8c] sm:$0xf0] }
  0x44   :  { %2786 = vmatpush.bf16.msrb.mxu2 %v2422_v2  ;;  %v2530_v2 = vor.u32 %v2760_v60, %v2529_v59  ;;  %v2506_v37 = vor.u32 %v2754_v30, %v2505_v28  ;;  %v2986_v59 = vor.u32 %v2621_v41, %v1983_v42  ;;  %v2625_v14 = vld [vmem:[#allocation2 + $0xd0] sm:$0xf0]  ;;  %v2720_v15 = vld [vmem:[#allocation5 + $0x2ec] sm:$0xf]  ;;  %v2363_v28 = vld [vmem:[#allocation5 + $0x2dc] sm:$0xf0] }
  0x45   :  { %v2555_v49 = vld [vmem:[#allocation5 + $0x45c] sm:$0xf0]  ;;  %s1871_s2 = sshll.u32 %s2909_s0, 4  ;;  %s1873_s5 = sshll.u32 %s3407_s3, 4  ;;  %s1872_s2 = int_to_ptr.vmem [resolvable:$true] %s1871_s2  ;;  %s1874_s5 = int_to_ptr.hbm [resolvable:$true] %s1873_s5 }
  0x46   :  { %1268 = vmatpush.bf16.msrb.mxu1 %v2122_v8  ;;  %1355 = vmatpush.bf16.msrb.mxu0 %v2410_v11  ;;  %v2974_v8 = vor.u32 %v2614_v62, %v1955_v63  ;;  %3422 = vst [vmem:[#allocation16_spill] sm:$0xff] %v2986_v59  ;;  %v2651_v63 = vld [vmem:[#allocation5 + $0xc4] sm:$0xf]  ;;  %s2910_s6 = smov 384   ;;  %s2911_s7 = smov 24  }
  0x47   :  { %1441 = vmatpush.bf16.msrb.mxu3 %v2042_v36  ;;  %v2624_v36 = vld [vmem:[#allocation2 + $0xc8] sm:$0xf0]  ;;  %v2102_v9 = vor.u32 %v2651_v63, %v2099_v0  ;;  %v2690_v63 = vld [vmem:[#allocation5 + $0x1fc] sm:$0xf]  ;;  %v2255_v0 = vld [vmem:[#allocation5 + $0x204] sm:$0xf0] }
  0x48   :  { %2787 = vmatpush.bf16.msrb.mxu2 %v2410_v11  ;;  %1334 = vmatmul.bf16.gmra.mxu3 %v2962_v29  ;;  %3420 = vst [vmem:[#allocation14_spill] sm:$0xff] %v2974_v8  ;;  %v2030_v11 = vor.u32 %v2633_v5, %v2027_v6  ;;  %v2613_v6 = vld [vmem:[#allocation2 + $0x74] sm:$0xf] }
  0x4a   :  { %1269 = vmatpush.bf16.msrb.mxu1 %v2110_v16  ;;  %1356 = vmatpush.bf16.msrb.mxu0 %v2398_v23  ;;  %v2150_v16 = vor.u32 %v2663_v12, %v2147_v13  ;;  %v2618_v12 = vld [vmem:[#allocation2 + $0x98] sm:$0xf0]  ;;  %v1989_v13 = vld [vmem:[#allocation2 + $0xb8] sm:$0xf] }
  0x4b   :  { %1442 = vmatpush.bf16.msrb.mxu3 %v2030_v11  ;;  %v1961_v11 = vld [vmem:[#allocation2 + $0x80] sm:$0xf]  ;;  %v2993_v21 = vor.u32 %v2625_v14, %v1989_v13  ;;  %v2543_v13 = vld [vmem:[#allocation5 + $0x444] sm:$0xf0]  ;;  %v2687_v14 = vld [vmem:[#allocation5 + $0x1e4] sm:$0xf] }
  0x4c   :  { %2788 = vmatpush.bf16.msrb.mxu2 %v2398_v23  ;;  %v2660_v23 = vld [vmem:[#allocation5 + $0x10c] sm:$0xf]  ;;  %v2991_v20 = vor.u32 %v2618_v12, %v1961_v11  ;;  %v2762_v11 = vld [vmem:[#allocation5 + $0x43c] sm:$0xf] }
  0x4d   :  { %v2138_v34 = vor.u32 %v2660_v23, %v2135_v26  ;;  %3424 = vst [vmem:[#allocation18_spill] sm:$0xff] %v2993_v21 }
  0x4e   :  { %1270 = vmatpush.bf16.msrb.mxu1 %v2098_v35  ;;  %1357 = vmatpush.bf16.msrb.mxu0 %v2386_v39  ;;  %v1981_v35 = vld [vmem:[#allocation2 + $0xb0] sm:$0xf]  ;;  %3423 = vst [vmem:[#allocation17_spill] sm:$0xff] %v2991_v20 }
  0x4f   :  { %1443 = vmatpush.bf16.msrb.mxu3 %v2018_v25  ;;  %v2981_v40 = vor.u32 %v2624_v36, %v1981_v35  ;;  %v2279_v25 = vld [vmem:[#allocation5 + $0x234] sm:$0xf0]  ;;  %v2693_v36 = vld [vmem:[#allocation5 + $0x214] sm:$0xf] }
  0x50   :  { %2789 = vmatpush.bf16.msrb.mxu2 %v2386_v39  ;;  %v2979_v39 = vor.u32 %v2611_v33, %v1933_v32  ;;  %v2459_v32 = vld [vmem:[#allocation5 + $0x39c] sm:$0xf0]  ;;  %v2768_v33 = vld [vmem:[#allocation5 + $0x46c] sm:$0xf]  ;;  %v2567_v35 = vld [vmem:[#allocation5 + $0x474] sm:$0xf0] }
  0x51   :  { %1271 = vmatmul.bf16.vlgmr.msrb.gmra.mxu1 %v2965_v52  ;;  %1358 = vmatmul.bf16.vlgmr.msrb.gmra.mxu0 %v2967_v53  ;;  %v2570_v41 = vor.u32 %v2768_v33, %v2567_v35  ;;  %v2423_v35 = vld [vmem:[#allocation5 + $0x354] sm:$0xf0] }
  0x52   :  { %1379 = vmatpush.bf16.msra.mxu1 %v2566_v38  ;;  %1466 = vmatpush.bf16.msra.mxu0 %v2186_v43  ;;  %v2977_v38 = vor.u32 %v2606_v27, %v1919_v31  ;;  %3421 = vst [vmem:[#allocation15_spill] sm:$0xff] %v2979_v39  ;;  %v2493_v43 = vld [vmem:[#allocation5 + $0x3d8] sm:$0xf]  ;;  %v2717_v27 = vld [vmem:[#allocation5 + $0x2d4] sm:$0xf] }
  0x53   :  { %1310 = vmatmul.bf16.gmra.mxu2 %v2969_v56  ;;  %v2494_v47 = vor.u32 %v2751_v44, %v2493_v43  ;;  %v2366_v30 = vor.u32 %v2717_v27, %v2363_v28  ;;  %v2741_v31 = vld [vmem:[#allocation5 + $0x394] sm:$0xf]  ;;  %v2714_v43 = vld [vmem:[#allocation5 + $0x2bc] sm:$0xf]  ;;  %v2351_v44 = vld [vmem:[#allocation5 + $0x2c4] sm:$0xf0] }
  0x54   :  { %1415 = vmatpush.bf16.msra.mxu2 %v2578_v17  ;;  %v2989_v17 = vor.u32 %v2613_v6, %v1947_v10  ;;  %v2354_v50 = vor.u32 %v2714_v43, %v2351_v44  ;;  %v2435_v10 = vld [vmem:[#allocation5 + $0x36c] sm:$0xf0]  ;;  %v2601_v27 = vld [vmem:[#allocation2 + $0x14] sm:$0xf]  ;;  %v2684_v43 = vld [vmem:[#allocation5 + $0x1cc] sm:$0xf] }
  0x55   :  { %v1907_v28 = vld [vmem:[#allocation2 + $0x2c] sm:$0xf0]  ;;  %v2231_v44 = vld [vmem:[#allocation5 + $0x1d4] sm:$0xf0] }
  0x56   :  { %1380 = vmatpush.bf16.msra.mxu1 %v2554_v51  ;;  %1467 = vmatpush.bf16.msra.mxu0 %v2174_v57  ;;  %v2006_v51 = vor.u32 %v2627_v45, %v2003_v48  ;;  %v2111_v57 = vld [vmem:[#allocation5 + $0xe4] sm:$0xf0]  ;;  %v2738_v45 = vld [vmem:[#allocation5 + $0x37c] sm:$0xf]  ;;  %v2765_v48 = vld [vmem:[#allocation5 + $0x454] sm:$0xf] }
  0x57   :  { %v2114_v60 = vor.u32 %v2654_v55, %v2111_v57  ;;  %v2620_v55 = vld [vmem:[#allocation2 + $0xac] sm:$0xf]  ;;  %v1975_v57 = vld [vmem:[#allocation2 + $0xc4] sm:$0xf0] }
  0x58   :  { %1339 = vmatmul.bf16.gmra.mxu3 %v2974_v8 }
  0x59   :  { %1444 = vmatpush.bf16.msrb.mxu3 %v2006_v51 }
  0x5a   :  { %1381 = vmatpush.bf16.msra.mxu1 %v2542_v58  ;;  %1468 = vmatpush.bf16.msra.mxu0 %v2162_v1  ;;  %v2481_v58 = vld [vmem:[#allocation5 + $0x3c0] sm:$0xf]  ;;  %v2744_v1 = vld [vmem:[#allocation5 + $0x3ac] sm:$0xf] }
  0x5b   :  { %v2482_v62 = vor.u32 %v2748_v61, %v2481_v58  ;;  %v1913_v58 = vld [vmem:[#allocation2 + $0x18] sm:$0xf]  ;;  %v2999_v61 = vor.u32 %v2620_v55, %v1975_v57 }
  0x5c   :  { %v2519_v57 = vld [vmem:[#allocation5 + $0x414] sm:$0xf0] }
  0x5e   :  { %1382 = vmatpush.bf16.msra.mxu1 %v2530_v2  ;;  %1469 = vmatpush.bf16.msra.mxu0 %v2150_v16  ;;  %v2471_v2 = vld [vmem:[#allocation5 + $0x3b4] sm:$0xf0] }
  0x5f   :  { %v2474_v5 = vor.u32 %v2744_v1, %v2471_v2  ;;  %v2375_v16 = vld [vmem:[#allocation5 + $0x2f4] sm:$0xf0]  ;;  %v2258_v1 = vor.u32 %v2690_v63, %v2255_v0  ;;  %v2711_v2 = vld [vmem:[#allocation5 + $0x2a4] sm:$0xf] }
  0x60   :  { %v2378_v23 = vor.u32 %v2720_v15, %v2375_v16  ;;  %v2243_v15 = vld [vmem:[#allocation5 + $0x1ec] sm:$0xf0]  ;;  %v2546_v16 = vor.u32 %v2762_v11, %v2543_v13  ;;  %v2619_v11 = vld [vmem:[#allocation2 + $0xa0] sm:$0xf0]  ;;  %v2726_v13 = vld [vmem:[#allocation5 + $0x31c] sm:$0xf] }
  0x61   :  { %1276 = vmatmul.bf16.gmra.mxu1 %v2977_v38  ;;  %1363 = vmatmul.bf16.gmra.mxu0 %v2979_v39 }
  0x62   :  { %1383 = vmatpush.bf16.msra.mxu1 %v2518_v24  ;;  %1470 = vmatpush.bf16.msra.mxu0 %v2138_v34  ;;  %v2696_v24 = vld [vmem:[#allocation5 + $0x22c] sm:$0xf]  ;;  %v2462_v34 = vor.u32 %v2741_v31, %v2459_v32  ;;  %v3008_v32 = vor.u32 %v2601_v27, %v1907_v28  ;;  %v2291_v27 = vld [vmem:[#allocation5 + $0x24c] sm:$0xf0]  ;;  %v2678_v28 = vld [vmem:[#allocation5 + $0x19c] sm:$0xf] }
  0x63   :  { %1315 = vmatmul.bf16.gmra.mxu2 %v2981_v40  ;;  %1553 = vmatpush.bf16.msra.mxu3 %v2474_v5  ;;  %v2282_v26 = vor.u32 %v2696_v24, %v2279_v25  ;;  %v2339_v5 = vld [vmem:[#allocation5 + $0x2ac] sm:$0xf0]  ;;  %v2708_v24 = vld [vmem:[#allocation5 + $0x28c] sm:$0xf]  ;;  %v2327_v25 = vld [vmem:[#allocation5 + $0x294] sm:$0xf0] }
  0x64   :  { %v2342_v6 = vor.u32 %v2711_v2, %v2339_v5  ;;  %v2612_v31 = vld [vmem:[#allocation2 + $0x68] sm:$0xf0]  ;;  %v2303_v2 = vld [vmem:[#allocation5 + $0x264] sm:$0xf0] }
  0x65   :  { %v2608_v5 = vld [vmem:[#allocation2 + $0x4c] sm:$0xf] }
  0x66   :  { %1384 = vmatpush.bf16.msra.mxu1 %v2506_v37  ;;  %1471 = vmatpush.bf16.msra.mxu0 %v2126_v54  ;;  %v2267_v37 = vld [vmem:[#allocation5 + $0x21c] sm:$0xf0]  ;;  %v2558_v54 = vor.u32 %v2765_v48, %v2555_v49 }
  0x67   :  { %v2270_v42 = vor.u32 %v2693_v36, %v2267_v37  ;;  %1554 = vmatpush.bf16.msra.mxu3 %v2462_v34  ;;  %v2732_v34 = vld [vmem:[#allocation5 + $0x34c] sm:$0xf]  ;;  %v2759_v36 = vld [vmem:[#allocation5 + $0x424] sm:$0xf]  ;;  %v2315_v48 = vld [vmem:[#allocation5 + $0x27c] sm:$0xf0] }
  0x68   :  { %1344 = vmatmul.bf16.gmra.mxu3 %v2986_v59  ;;  %v2426_v37 = vor.u32 %v2732_v34, %v2423_v35  ;;  %v2723_v34 = vld [vmem:[#allocation5 + $0x304] sm:$0xf] }
  0x6a   :  { %1385 = vmatpush.bf16.msra.mxu1 %v2494_v47  ;;  %1472 = vmatpush.bf16.msra.mxu0 %v2114_v60  ;;  %v2447_v47 = vld [vmem:[#allocation5 + $0x384] sm:$0xf0]  ;;  %v2605_v60 = vld [vmem:[#allocation2 + $0x30] sm:$0xf0] }
  0x6b   :  { %v2450_v51 = vor.u32 %v2738_v45, %v2447_v47  ;;  %v2234_v45 = vor.u32 %v2684_v43, %v2231_v44  ;;  %v2705_v47 = vld [vmem:[#allocation5 + $0x274] sm:$0xf]  ;;  %v2675_v44 = vld [vmem:[#allocation5 + $0x184] sm:$0xf] }
  0x6c   :  { %v2318_v49 = vor.u32 %v2705_v47, %v2315_v48  ;;  %v2747_v47 = vld [vmem:[#allocation5 + $0x3c4] sm:$0xf] }
  0x6d   :  { %1555 = vmatpush.bf16.msra.mxu3 %v2450_v51  ;;  %v2411_v51 = vld [vmem:[#allocation5 + $0x33c] sm:$0xf0] }
  0x6e   :  { %1386 = vmatpush.bf16.msra.mxu1 %v2482_v62  ;;  %1473 = vmatpush.bf16.msra.mxu0 %v2102_v9  ;;  %v3001_v62 = vor.u32 %v2605_v60, %v1913_v58  ;;  %v2735_v9 = vld [vmem:[#allocation5 + $0x364] sm:$0xf]  ;;  %v2681_v58 = vld [vmem:[#allocation5 + $0x1b4] sm:$0xf]  ;;  %v2219_v60 = vld [vmem:[#allocation5 + $0x1bc] sm:$0xf0] }
  0x6f   :  { %v2438_v12 = vor.u32 %v2735_v9, %v2435_v10  ;;  %v2222_v0 = vor.u32 %v2681_v58, %v2219_v60  ;;  %v1969_v10 = vld [vmem:[#allocation2 + $0x88] sm:$0xf]  ;;  %v1963_v58 = vld [vmem:[#allocation2 + $0x9c] sm:$0xf0] }
  0x70   :  { %v1997_v60 = vld [vmem:[#allocation2 + $0xc0] sm:$0xf] }
  0x71   :  { %1281 = vmatmul.bf16.gmra.mxu1 %v2989_v17  ;;  %1368 = vmatmul.bf16.gmra.mxu0 %v2991_v20 }
  0x72   :  { %1495 = vmatpush.bf16.msrb.mxu1 %v2282_v26  ;;  %1582 = vmatpush.bf16.msrb.mxu0 %v2570_v41  ;;  %v2330_v26 = vor.u32 %v2708_v24, %v2327_v25  ;;  %v2531_v41 = vld [vmem:[#allocation5 + $0x42c] sm:$0xf0]  ;;  %v2507_v24 = vld [vmem:[#allocation5 + $0x3fc] sm:$0xf0]  ;;  %v2699_v25 = vld [vmem:[#allocation5 + $0x244] sm:$0xf] }
  0x73   :  { %1373 = vmatmul.bf16.vlgmr.msrb.gmra.mxu2 %v2993_v21  ;;  %1556 = vmatpush.bf16.msra.mxu3 %v2438_v12 }
  0x74   :  { %1524 = vmatpush.bf16.msrb.mxu2 %v2378_v23  ;;  %v2246_v23 = vor.u32 %v2687_v14, %v2243_v15  ;;  %v2399_v14 = vld [vmem:[#allocation5 + $0x324] sm:$0xf0]  ;;  %v3019_v15 = vor.u32 %v2619_v11, %v1969_v10  ;;  %v2771_v10 = vld [vmem:[#allocation5 + $0x484] sm:$0xf] }
  0x76   :  { %1496 = vmatpush.bf16.msrb.mxu1 %v2270_v42  ;;  %1583 = vmatpush.bf16.msrb.mxu0 %v2558_v54  ;;  %v2534_v42 = vor.u32 %v2759_v36, %v2531_v41  ;;  %v2756_v54 = vld [vmem:[#allocation5 + $0x40c] sm:$0xf]  ;;  %v2387_v36 = vld [vmem:[#allocation5 + $0x30c] sm:$0xf0]  ;;  %v2750_v41 = vld [vmem:[#allocation5 + $0x3dc] sm:$0xf] }
  0x77   :  { %1557 = vmatpush.bf16.msra.mxu3 %v2426_v37  ;;  %v2522_v63 = vor.u32 %v2756_v54, %v2519_v57  ;;  %v2390_v37 = vor.u32 %v2723_v34, %v2387_v36  ;;  %v2615_v57 = vld [vmem:[#allocation2 + $0x84] sm:$0xf]  ;;  %v2622_v34 = vld [vmem:[#allocation2 + $0xbc] sm:$0xf] }
  0x78   :  { %1525 = vmatpush.bf16.msrb.mxu2 %v2366_v30  ;;  %1445 = vmatmul.bf16.vlgmr.msrb.gmra.mxu3 %v2943_v19  ;;  %v1941_v30 = vld [vmem:[#allocation2 + $0x50] sm:$0xf] }
  0x79   :  { %v3010_v33 = vor.u32 %v2612_v31, %v1941_v30  ;;  %v2207_v30 = vld [vmem:[#allocation5 + $0x1a4] sm:$0xf0]  ;;  %v2294_v31 = vor.u32 %v2699_v25, %v2291_v27 }
  0x7a   :  { %1497 = vmatpush.bf16.msrb.mxu1 %v2258_v1  ;;  %1584 = vmatpush.bf16.msrb.mxu0 %v2546_v16  ;;  %v2702_v1 = vld [vmem:[#allocation5 + $0x25c] sm:$0xf]  ;;  %v2402_v16 = vor.u32 %v2726_v13, %v2399_v14  ;;  %v2210_v35 = vor.u32 %v2678_v28, %v2207_v30  ;;  %v2579_v13 = vld [vmem:[#allocation5 + $0x48c] sm:$0xf0]  ;;  %v2177_v28 = vld [vmem:[#allocation5 + $0x158] sm:$0xf] }
  0x7b   :  { %v2306_v9 = vor.u32 %v2702_v1, %v2303_v2  ;;  %v2582_v14 = vor.u32 %v2771_v10, %v2579_v13  ;;  %v2671_v30 = vld [vmem:[#allocation5 + $0x160] sm:$0xf0]  ;;  %v2641_v10 = vld [vmem:[#allocation5 + $0x70] sm:$0xf0] }
  0x7c   :  { %1526 = vmatpush.bf16.msrb.mxu2 %v2354_v50  ;;  %v2729_v50 = vld [vmem:[#allocation5 + $0x334] sm:$0xf]  ;;  %v2178_v36 = vor.u32 %v2671_v30, %v2177_v28  ;;  %v2261_v28 = vld [vmem:[#allocation5 + $0x200] sm:$0xf] }
  0x7d   :  { %v2414_v55 = vor.u32 %v2729_v50, %v2411_v51  ;;  %v2093_v50 = vld [vmem:[#allocation5 + $0xb0] sm:$0xf]  ;;  %v2650_v51 = vld [vmem:[#allocation5 + $0xb8] sm:$0xf0] }
  0x7e   :  { %1498 = vmatpush.bf16.msrb.mxu1 %v2246_v23  ;;  %1585 = vmatpush.bf16.msrb.mxu0 %v2534_v42  ;;  %v2753_v23 = vld [vmem:[#allocation5 + $0x3f4] sm:$0xf]  ;;  %v2495_v42 = vld [vmem:[#allocation5 + $0x3e4] sm:$0xf0] }
  0x7f   :  { %1558 = vmatpush.bf16.msra.mxu3 %v2414_v55  ;;  %v2498_v43 = vor.u32 %v2750_v41, %v2495_v42  ;;  %v2094_v55 = vor.u32 %v2650_v51, %v2093_v50  ;;  %v2165_v51 = vld [vmem:[#allocation5 + $0x140] sm:$0xf] }
  0x80   :  { %1527 = vmatpush.bf16.msrb.mxu2 %v2342_v6  ;;  %v1935_v6 = vld [vmem:[#allocation2 + $0x64] sm:$0xf0] }
  0x81   :  { %1286 = vmatmul.bf16.gmra.mxu1 %v2999_v61  ;;  %1474 = vmatmul.bf16.vlgmr.msra.gmra.mxu0 %v2965_v52  ;;  %v3017_v12 = vor.u32 %v2608_v5, %v1935_v6  ;;  %v2189_v6 = vld [vmem:[#allocation5 + $0x170] sm:$0xf] }
  0x82   :  { %1499 = vmatpush.bf16.msrb.mxu1 %v2234_v45  ;;  %1586 = vmatpush.bf16.msrb.mxu0 %v2522_v63  ;;  %v2195_v45 = vld [vmem:[#allocation5 + $0x18c] sm:$0xf0]  ;;  %v2626_v63 = vld [vmem:[#allocation2 + $0xd8] sm:$0xf0] }
  0x83   :  { %2587 = vmatmul.msk.bf16.vlgmr.msra.gmra.mxu2 %vm1221_vm0, %v3001_v62  ;;  %1559 = vmatpush.bf16.msra.mxu3 %v2402_v16  ;;  %v2198_v48 = vor.u32 %v2675_v44, %v2195_v45  ;;  %v3032_v5 = vor.u32 %v2626_v63, %v1997_v60  ;;  %v2069_v45 = vld [vmem:[#allocation5 + $0x80] sm:$0xf] }
  0x84   :  { %1528 = vmatpush.bf16.msrb.mxu2 %v2330_v26  ;;  %v2510_v26 = vor.u32 %v2753_v23, %v2507_v24  ;;  %v2081_v23 = vld [vmem:[#allocation5 + $0x98] sm:$0xf]  ;;  %v2647_v24 = vld [vmem:[#allocation5 + $0xa0] sm:$0xf0] }
  0x85   :  { %v2082_v27 = vor.u32 %v2647_v24, %v2081_v23  ;;  %v3066_v23 = vld [vmem:[#allocation7] sm:$0x7]  ;;  %v2153_v24 = vld [vmem:[#allocation5 + $0x128] sm:$0xf] }
  0x86   :  { %1500 = vmatpush.bf16.msrb.mxu1 %v2222_v0  ;;  %1587 = vmatpush.bf16.msrb.mxu0 %v2510_v26  ;;  %v3026_v0 = vor.u32 %v2615_v57, %v1963_v58  ;;  %v2695_v58 = vld [vmem:[#allocation5 + $0x220] sm:$0xf0]  ;;  %3427 = vst [vmem:[#allocation21_spill] sm:$0xff] %v3066_v23 }
  0x87   :  { %1560 = vmatpush.bf16.msra.mxu3 %v2390_v37  ;;  %v2698_v37 = vld [vmem:[#allocation5 + $0x238] sm:$0xf0] }
  0x88   :  { %1450 = vmatmul.bf16.gmra.mxu3 %v2955_v4  ;;  %1529 = vmatpush.bf16.msrb.mxu2 %v2318_v49  ;;  %v2483_v49 = vld [vmem:[#allocation5 + $0x3cc] sm:$0xf0]  ;;  %3425 = vst [vmem:[#allocation19_spill] sm:$0xff] %v3026_v0 }
  0x89   :  { %v2486_v54 = vor.u32 %v2747_v47, %v2483_v49  ;;  %v2644_v47 = vld [vmem:[#allocation5 + $0x88] sm:$0xf0] }
  0x8a   :  { %1501 = vmatpush.bf16.msrb.mxu1 %v2210_v35  ;;  %1588 = vmatpush.bf16.msrb.mxu0 %v2498_v43  ;;  %v1991_v35 = vld [vmem:[#allocation2 + $0xd4] sm:$0xf0]  ;;  %v2070_v50 = vor.u32 %v2644_v47, %v2069_v45  ;;  %v2045_v45 = vld [vmem:[#allocation5 + $0x50] sm:$0xf]  ;;  %v2638_v47 = vld [vmem:[#allocation5 + $0x58] sm:$0xf0] }
  0x8b   :  { %v3049_v44 = vor.u32 %v2622_v34, %v1991_v35  ;;  %v3070_v34 = vperm.slane %v3066_v23, 0 }
  0x8c   :  { %1530 = vmatpush.bf16.msrb.mxu2 %v2306_v9  ;;  %v2674_v9 = vld [vmem:[#allocation5 + $0x178] sm:$0xf0] }
  0x8d   :  { %v2190_v11 = vor.u32 %v2674_v9, %v2189_v6  ;;  %3426 = vst [vmem:[#allocation20_spill] sm:$0xff] %v3049_v44  ;;  %v2057_v9 = vld [vmem:[#allocation5 + $0x68] sm:$0xf] }
  0x8e   :  { %1502 = vmatpush.bf16.msrb.mxu1 %v2198_v48  ;;  %1589 = vmatpush.bf16.msrb.mxu0 %v2486_v54  ;;  %v2668_v54 = vld [vmem:[#allocation5 + $0x148] sm:$0xf0] }
  0x8f   :  { %1669 = vmatpush.bf16.msrb.mxu3 %v2190_v11  ;;  %v2166_v57 = vor.u32 %v2668_v54, %v2165_v51  ;;  %v2046_v54 = vor.u32 %v2638_v47, %v2045_v45 }
  0x90   :  { %1531 = vmatpush.bf16.msrb.mxu2 %v2294_v31  ;;  %v2285_v31 = vld [vmem:[#allocation5 + $0x230] sm:$0xf] }
  0x91   :  { %1387 = vmatmul.bf16.vlgmr.msra.gmra.mxu1 %v3008_v32  ;;  %1479 = vmatmul.bf16.gmra.mxu0 %v2977_v38  ;;  %v2286_v41 = vor.u32 %v2698_v37, %v2285_v31  ;;  %v2692_v31 = vld [vmem:[#allocation5 + $0x208] sm:$0xf0] }
  0x92   :  { %1618 = vmatpush.bf16.msra.mxu1 %v2582_v14  ;;  %v2058_v14 = vor.u32 %v2641_v10, %v2057_v9  ;;  %v2262_v35 = vor.u32 %v2692_v31, %v2261_v28  ;;  %v2689_v10 = vld [vmem:[#allocation5 + $0x1f0] sm:$0xf0]  ;;  %v2033_v28 = vld [vmem:[#allocation5 + $0x38] sm:$0xf] }
  0x93   :  { %2588 = vmatmul.msk.bf16.gmra.mxu2 %vm1221_vm0, %v3010_v33  ;;  %1670 = vmatpush.bf16.msrb.mxu3 %v2178_v36 }
  0x94   :  { %1640 = vmatpush.bf16.msra.mxu2 %v2094_v55  ;;  %1698 = vmatpush.bf16.msra.mxu0 %v2286_v41  ;;  %v2273_v55 = vld [vmem:[#allocation5 + $0x218] sm:$0xf] }
  0x95   :  { %v2274_v60 = vor.u32 %v2695_v58, %v2273_v55  ;;  %v2141_v58 = vld [vmem:[#allocation5 + $0x110] sm:$0xf] }
  0x97   :  { %1671 = vmatpush.bf16.msrb.mxu3 %v2166_v57 }
  0x98   :  { %1455 = vmatmul.bf16.gmra.mxu3 %v2941_v18  ;;  %1641 = vmatpush.bf16.msra.mxu2 %v2082_v27  ;;  %v2665_v27 = vld [vmem:[#allocation5 + $0x130] sm:$0xf0] }
  0x99   :  { %1699 = vmatpush.bf16.msra.mxu0 %v2274_v60  ;;  %v2154_v30 = vor.u32 %v2665_v27, %v2153_v24  ;;  %v2249_v60 = vld [vmem:[#allocation5 + $0x1e8] sm:$0xf] }
  0x9b   :  { %1672 = vmatpush.bf16.msrb.mxu3 %v2154_v30  ;;  %v2635_v30 = vld [vmem:[#allocation5 + $0x40] sm:$0xf0] }
  0x9c   :  { %1642 = vmatpush.bf16.msra.mxu2 %v2070_v50 }
  0x9d   :  { %1700 = vmatpush.bf16.msra.mxu0 %v2262_v35 }
  0xa0   :  { %1643 = vmatpush.bf16.msra.mxu2 %v2058_v14  ;;  %v2250_v14 = vor.u32 %v2689_v10, %v2249_v60  ;;  %v2021_v60 = vld [vmem:[#allocation5 + $0x20] sm:$0xf] }
  0xa1   :  { %1392 = vmatmul.bf16.gmra.mxu1 %v3017_v12  ;;  %1484 = vmatmul.bf16.gmra.mxu0 %v2989_v17 }
  0xa2   :  { %1701 = vmatpush.bf16.msra.mxu0 %v2250_v14 }
  0xa3   :  { %2589 = vmatmul.msk.bf16.gmra.mxu2 %vm1221_vm0, %v3019_v15 }
  0xa4   :  { %1644 = vmatpush.bf16.msra.mxu2 %v2046_v54  ;;  %v2659_v54 = vld [vmem:[#allocation5 + $0x100] sm:$0xf0] }
  0xa8   :  { %1460 = vmatmul.bf16.gmra.mxu3 %v2953_v3 }
  0xae   :  { %v3028_v1 = vpop.f32.mrf.mxu1  ;;  %v3030_v2 = vpop.f32.mrf.mxu0 }
  0xaf   :  { %v1244_v37 = vadd.f32 %v3030_v2, %v3070_v34  ;;  %v2662_v2 = vld [vmem:[#allocation5 + $0x118] sm:$0xf0] }
  0xb0   :  { %v2142_v9 = vor.u32 %v2662_v2, %v2141_v58  ;;  %v2686_v58 = vld [vmem:[#allocation5 + $0x1d8] sm:$0xf0] }
  0xb1   :  { %1397 = vmatmul.bf16.gmra.mxu1 %v3026_v0  ;;  %1489 = vmatmul.bf16.gmra.mxu0 %v2999_v61 }
  0xb2   :  { %1673 = vmatpush.bf16.msrb.mxu3 %v2142_v9  ;;  %v2632_v9 = vld [vmem:[#allocation5 + $0x28] sm:$0xf0] }
  0xb3   :  { %2590 = vmatmul.msk.bf16.gmra.mxu2 %vm1221_vm0, %v3032_v5  ;;  %v2022_v14 = vor.u32 %v2632_v9, %v2021_v60  ;;  %v2105_v60 = vld [vmem:[#allocation5 + $0xc8] sm:$0xf] }
  0xb6   :  { %v3038_v16 = vpop.f32.mrf.mxu2  ;;  %v3040_v25 = vpop.f32.mrf.mxu1 }
  0xb7   :  { %v3042_v26 = vpop.f32.mrf.mxu0 }
  0xb8   :  { %1561 = vmatmul.bf16.vlgmr.msra.gmra.mxu3 %v2967_v53  ;;  %v1246_v27 = vadd.f32 %v3042_v26, %v3070_v34 }
  0xbb   :  { %v3045_v42 = vpop.f32.mrf.mxu3 }
  0xbe   :  { %v3047_v43 = vpop.f32.mrf.mxu2  ;;  %v3051_v48 = vpop.f32.mrf.mxu1 }
  0xbf   :  { %v3053_v49 = vpop.f32.mrf.mxu0 }
  0xc1   :  { %1402 = vmatmul.bf16.gmra.mxu1 %v3049_v44  ;;  %1590 = vmatmul.bf16.vlgmr.msrb.gmra.mxu0 %v3008_v32 }
  0xc3   :  { %1532 = vmatmul.bf16.vlgmr.msrb.gmra.mxu2 %v2950_v46  ;;  %v3058_v63 = vpop.f32.mrf.mxu3 }
  0xc6   :  { %v3060_v6 = vpop.f32.mrf.mxu2  ;;  %v3062_v11 = vpop.f32.mrf.mxu1 }
  0xc7   :  { %v3064_v13 = vpop.f32.mrf.mxu0 }
  0xc8   :  { %1566 = vmatmul.bf16.gmra.mxu3 %v2979_v39 }
  0xcb   :  { %v3072_v36 = vpop.f32.mrf.mxu3 }
  0xce   :  { %v3076_v41 = vpop.f32.mrf.mxu2  ;;  %v1272_v50 = vpop.f32.mrf.mxu1 }
  0xcf   :  { %v3078_v51 = vpop.f32.mrf.mxu0  ;;  %v1273_v55 = vadd.f32 %v1272_v50, %v1244_v37  ;;  %v2034_v37 = vor.u32 %v2635_v30, %v2033_v28  ;;  %v2129_v50 = vld [vmem:[#allocation5 + $0xf8] sm:$0xf]  ;;  %v2656_v30 = vld [vmem:[#allocation5 + $0xe8] sm:$0xf0] }
  0xd0   :  { %v2130_v26 = vor.u32 %v2659_v54, %v2129_v50  ;;  %v2009_v54 = vld [vmem:[#allocation5 + $0x8] sm:$0xf] }
  0xd1   :  { %v3081_v57 = vadd.f32 %v3038_v16, %v1273_v55  ;;  %1503 = vmatmul.bf16.vlgmr.msrb.gmra.mxu1 %v2945_v22  ;;  %1595 = vmatmul.bf16.gmra.mxu0 %v3017_v12  ;;  %v2237_v55 = vld [vmem:[#allocation5 + $0x1d0] sm:$0xf] }
  0xd2   :  { %1645 = vmatpush.bf16.msra.mxu2 %v2034_v37  ;;  %v2238_v2 = vor.u32 %v2686_v58, %v2237_v55  ;;  %1674 = vmatpush.bf16.msrb.mxu3 %v2130_v26  ;;  %v2629_v55 = vld [vmem:[#allocation5 + $0x10] sm:$0xf0] }
  0xd3   :  { %1537 = vmatmul.bf16.gmra.mxu2 %v2962_v29  ;;  %v3086_v24 = vpop.f32.mrf.mxu3  ;;  %v2010_v58 = vor.u32 %v2629_v55, %v2009_v54  ;;  %v2585_v29 = vld [vmem:[#allocation5 + $0x488] sm:$0xf] }
  0xd4   :  { %1702 = vmatpush.bf16.msra.mxu0 %v2238_v2  ;;  %v2683_v2 = vld [vmem:[#allocation5 + $0x1c0] sm:$0xf0] }
  0xd6   :  { %v3090_v16 = vpop.f32.mrf.mxu2  ;;  %v1274_v31 = vpop.f32.mrf.mxu1  ;;  %1646 = vmatpush.bf16.msra.mxu2 %v2022_v14  ;;  %v2653_v14 = vld [vmem:[#allocation5 + $0xd0] sm:$0xf0] }
  0xd7   :  { %v3092_v35 = vpop.f32.mrf.mxu0  ;;  %v1275_v45 = vadd.f32 %v1274_v31, %v1246_v27  ;;  %v1249_v27 = vadd.f32 %v3053_v49, %v3070_v34  ;;  %v2225_v49 = vld [vmem:[#allocation5 + $0x1b8] sm:$0xf] }
  0xd8   :  { %1571 = vmatmul.bf16.gmra.mxu3 %v2991_v20  ;;  %v2226_v9 = vor.u32 %v2683_v2, %v2225_v49  ;;  %v2201_v49 = vld [vmem:[#allocation5 + $0x188] sm:$0xf]  ;;  %v2677_v2 = vld [vmem:[#allocation5 + $0x190] sm:$0xf0]  ;;  %v1254_v20 = vadd.f32 %v3028_v1, %v3070_v34 }
  0xd9   :  { %v3095_v47 = vadd.f32 %v3047_v43, %v1275_v45  ;;  %v2117_v43 = vld [vmem:[#allocation5 + $0xe0] sm:$0xf] }
  0xda   :  { %v2118_v45 = vor.u32 %v2656_v30, %v2117_v43  ;;  %1647 = vmatpush.bf16.msra.mxu2 %v2010_v58  ;;  %1703 = vmatpush.bf16.msra.mxu0 %v2226_v9  ;;  %v2746_v9 = vld [vmem:[#allocation5 + $0x3b8] sm:$0xf0] }
  0xdb   :  { %v3098_v10 = vpop.f32.mrf.mxu3 }
  0xdc   :  { %1675 = vmatpush.bf16.msrb.mxu3 %v2118_v45  ;;  %v2680_v45 = vld [vmem:[#allocation5 + $0x1a8] sm:$0xf0] }
  0xde   :  { %v3102_v28 = vpop.f32.mrf.mxu2  ;;  %v1277_v31 = vpop.f32.mrf.mxu1 }
  0xdf   :  { %v3104_v37 = vpop.f32.mrf.mxu0  ;;  %v1278_v50 = vadd.f32 %v1277_v31, %v1249_v27  ;;  %v2106_v27 = vor.u32 %v2653_v14, %v2105_v60  ;;  %v2213_v31 = vld [vmem:[#allocation5 + $0x1a0] sm:$0xf]  ;;  %v2202_v60 = vor.u32 %v2677_v2, %v2201_v49  ;;  %v2381_v49 = vld [vmem:[#allocation5 + $0x2f0] sm:$0xf] }
  0xe0   :  { %v2214_v55 = vor.u32 %v2680_v45, %v2213_v31 }
  0xe1   :  { %v3107_v26 = vadd.f32 %v3060_v6, %v1278_v50  ;;  %1508 = vmatmul.bf16.gmra.mxu1 %v2957_v7  ;;  %1600 = vmatmul.bf16.gmra.mxu0 %v3026_v0  ;;  %v1251_v6 = vadd.f32 %v3064_v13, %v3070_v34  ;;  %v2477_v13 = vld [vmem:[#allocation5 + $0x3b0] sm:$0xf]  ;;  %v2719_v0 = vld [vmem:[#allocation5 + $0x2e0] sm:$0xf0] }
  0xe2   :  { %1676 = vmatpush.bf16.msrb.mxu3 %v2106_v27  ;;  %1704 = vmatpush.bf16.msra.mxu0 %v2214_v55  ;;  %v2478_v14 = vor.u32 %v2746_v9, %v2477_v13  ;;  %v2770_v55 = vld [vmem:[#allocation5 + $0x478] sm:$0xf0]  ;;  %v2465_v13 = vld [vmem:[#allocation5 + $0x398] sm:$0xf]  ;;  %v2743_v9 = vld [vmem:[#allocation5 + $0x3a0] sm:$0xf0] }
  0xe3   :  { %1542 = vmatmul.bf16.gmra.mxu2 %v2974_v8  ;;  %v3112_v43 = vpop.f32.mrf.mxu3 }
  0xe4   :  { %1756 = vmatpush.bf16.msrb.mxu2 %v2478_v14 }
  0xe6   :  { %v3116_v30 = vpop.f32.mrf.mxu2  ;;  %v1279_v50 = vpop.f32.mrf.mxu1  ;;  %1705 = vmatpush.bf16.msra.mxu0 %v2202_v60  ;;  %v2722_v60 = vld [vmem:[#allocation5 + $0x2f8] sm:$0xf0] }
  0xe7   :  { %v3118_v54 = vpop.f32.mrf.mxu0  ;;  %v1280_v8 = vadd.f32 %v1279_v50, %v1251_v6  ;;  %v2573_v50 = vld [vmem:[#allocation5 + $0x470] sm:$0xf]  ;;  %v2382_v14 = vor.u32 %v2722_v60, %v2381_v49 }
  0xe8   :  { %1576 = vmatmul.bf16.gmra.mxu3 %v2993_v21  ;;  %v2574_v2 = vor.u32 %v2770_v55, %v2573_v50  ;;  %v3151_v50 = vperm.slane %v3066_v23, 1  ;;  %v2767_v55 = vld [vmem:[#allocation5 + $0x460] sm:$0xf0] }
  0xe9   :  { %v3121_v58 = vadd.f32 %v3076_v41, %v1280_v8  ;;  %1727 = vmatpush.bf16.msrb.mxu1 %v2382_v14  ;;  %v2453_v14 = vld [vmem:[#allocation5 + $0x380] sm:$0xf] }
  0xea   :  { %1785 = vmatpush.bf16.msra.mxu3 %v2574_v2  ;;  %v1259_v2 = vadd.f32 %v3051_v48, %v3070_v34 }
  0xeb   :  { %v3124_v27 = vpop.f32.mrf.mxu3 }
  0xee   :  { %v3128_v31 = vpop.f32.mrf.mxu2  ;;  %v1282_v6 = vpop.f32.mrf.mxu1 }
  0xef   :  { %v3130_v8 = vpop.f32.mrf.mxu0  ;;  %v1283_v41 = vadd.f32 %v1282_v6, %v1254_v20  ;;  %v1256_v20 = vadd.f32 %v3040_v25, %v3070_v34  ;;  %v2466_v6 = vor.u32 %v2743_v9, %v2465_v13  ;;  %v2561_v25 = vld [vmem:[#allocation5 + $0x458] sm:$0xf]  ;;  %v2773_v13 = vld [vmem:[#allocation5 + $0x490] sm:$0xf0] }
  0xf0   :  { %v2562_v60 = vor.u32 %v2767_v55, %v2561_v25  ;;  %v2369_v9 = vld [vmem:[#allocation5 + $0x2d8] sm:$0xf]  ;;  %v2357_v55 = vld [vmem:[#allocation5 + $0x2c0] sm:$0xf] }
  0xf1   :  { %v3133_v45 = vadd.f32 %v3090_v16, %v1283_v41  ;;  %1513 = vmatmul.bf16.gmra.mxu1 %v2969_v56  ;;  %1605 = vmatmul.bf16.gmra.mxu0 %v3049_v44 }
  0xf2   :  { %1757 = vmatpush.bf16.msrb.mxu2 %v2466_v6  ;;  %v2740_v6 = vld [vmem:[#allocation5 + $0x388] sm:$0xf0]  ;;  %1786 = vmatpush.bf16.msra.mxu3 %v2562_v60 }
  0xf3   :  { %1547 = vmatmul.bf16.gmra.mxu2 %v2986_v59  ;;  %v3138_v1 = vpop.f32.mrf.mxu3  ;;  %v2454_v39 = vor.u32 %v2740_v6, %v2453_v14  ;;  %v1331_v14 = vadd.f32 %v3045_v42, %v3081_v57 }
  0xf6   :  { %v3142_v16 = vpop.f32.mrf.mxu2  ;;  %v1284_v41 = vpop.f32.mrf.mxu1  ;;  %1758 = vmatpush.bf16.msrb.mxu2 %v2454_v39  ;;  %v1261_v39 = vadd.f32 %v3062_v11, %v3070_v34  ;;  %v2537_v11 = vld [vmem:[#allocation5 + $0x428] sm:$0xf]  ;;  %v2761_v34 = vld [vmem:[#allocation5 + $0x430] sm:$0xf0] }
  0xf7   :  { %v3144_v21 = vpop.f32.mrf.mxu0  ;;  %v1285_v59 = vadd.f32 %v1284_v41, %v1256_v20 }
  0xf8   :  { %1677 = vmatmul.bf16.vlgmr.msrb.gmra.mxu3 %v2965_v52  ;;  %v2370_v52 = vor.u32 %v2719_v0, %v2369_v9  ;;  %v2764_v0 = vld [vmem:[#allocation5 + $0x448] sm:$0xf0]  ;;  %v2737_v9 = vld [vmem:[#allocation5 + $0x370] sm:$0xf0] }
  0xf9   :  { %v3147_v44 = vadd.f32 %v3102_v28, %v1285_v59  ;;  %v2586_v28 = vor.u32 %v2773_v13, %v2585_v29  ;;  %v2549_v29 = vld [vmem:[#allocation5 + $0x440] sm:$0xf]  ;;  %v2716_v13 = vld [vmem:[#allocation5 + $0x2c8] sm:$0xf0] }
  0xfa   :  { %1728 = vmatpush.bf16.msrb.mxu1 %v2370_v52  ;;  %v2550_v60 = vor.u32 %v2764_v0, %v2549_v29  ;;  %v2538_v0 = vor.u32 %v2761_v34, %v2537_v11  ;;  %v2710_v11 = vld [vmem:[#allocation5 + $0x298] sm:$0xf0]  ;;  %v2417_v34 = vld [vmem:[#allocation5 + $0x338] sm:$0xf] }
  0xfb   :  { %v1446_v49 = vpop.f32.mrf.mxu3  ;;  %1821 = vmatpush.bf16.msrb.mxu0 %v2586_v28 }
  0xfc   :  { %v1447_v59 = vadd.f32 %v1446_v49, %v3151_v50  ;;  %1787 = vmatpush.bf16.msra.mxu3 %v2550_v60  ;;  %v2734_v60 = vld [vmem:[#allocation5 + $0x358] sm:$0xf0] }
  0xfe   :  { %v3155_v20 = vpop.f32.mrf.mxu2  ;;  %v1287_v41 = vpop.f32.mrf.mxu1 }
  0xff   :  { %v1475_v23 = vpop.f32.mrf.mxu0  ;;  %v1288_v46 = vadd.f32 %v1287_v41, %v1259_v2  ;;  %v2345_v41 = vld [vmem:[#allocation5 + $0x2a8] sm:$0xf] }
 0x100   :  { %v3158_v25 = vadd.f32 %v1475_v23, %v1447_v59  ;;  %v2441_v23 = vld [vmem:[#allocation5 + $0x368] sm:$0xf]  ;;  %1788 = vmatpush.bf16.msra.mxu3 %v2538_v0 }
 0x101   :  { %v3161_v48 = vadd.f32 %v3116_v30, %v1288_v46  ;;  %1518 = vmatmul.bf16.gmra.mxu1 %v2981_v40  ;;  %1706 = vmatmul.bf16.vlgmr.msra.gmra.mxu0 %v2945_v22  ;;  %v2358_v30 = vor.u32 %v2716_v13, %v2357_v55  ;;  %v2442_v59 = vor.u32 %v2737_v9, %v2441_v23  ;;  %v2713_v55 = vld [vmem:[#allocation5 + $0x2b0] sm:$0xf0] }
 0x102   :  { %v1360_v13 = vadd.f32 %v3078_v51, %v1331_v14  ;;  %v2525_v51 = vld [vmem:[#allocation5 + $0x410] sm:$0xf] }
 0x103   :  { %1648 = vmatmul.bf16.vlgmr.msra.gmra.mxu2 %v2943_v19  ;;  %v1448_v49 = vpop.f32.mrf.mxu3  ;;  %1729 = vmatpush.bf16.msrb.mxu1 %v2358_v30  ;;  %v1333_v30 = vadd.f32 %v3058_v63, %v3095_v47  ;;  %v2333_v14 = vld [vmem:[#allocation5 + $0x290] sm:$0xf] }
 0x104   :  { %v1449_v46 = vadd.f32 %v1448_v49, %v3151_v50  ;;  %1759 = vmatpush.bf16.msrb.mxu2 %v2442_v59  ;;  %v2429_v49 = vld [vmem:[#allocation5 + $0x350] sm:$0xf]  ;;  %v2334_v47 = vor.u32 %v2710_v11, %v2333_v14 }
 0x105   :  { %v2430_v42 = vor.u32 %v2734_v60, %v2429_v49  ;;  %v1336_v60 = vadd.f32 %v3072_v36, %v3107_v26  ;;  %v2501_v26 = vld [vmem:[#allocation5 + $0x3e0] sm:$0xf] }
 0x106   :  { %v1417_v2 = vpop.f32.mrf.mxu2  ;;  %v1289_v28 = vpop.f32.mrf.mxu1 }
 0x107   :  { %v1477_v22 = vpop.f32.mrf.mxu0  ;;  %v1290_v19 = vadd.f32 %v1289_v28, %v1261_v39  ;;  %v2346_v39 = vor.u32 %v2713_v55, %v2345_v41  ;;  %v2758_v28 = vld [vmem:[#allocation5 + $0x418] sm:$0xf0]  ;;  %v1362_v41 = vadd.f32 %v3092_v35, %v1333_v30  ;;  %v2513_v35 = vld [vmem:[#allocation5 + $0x3f8] sm:$0xf]  ;;  %v2405_v30 = vld [vmem:[#allocation5 + $0x320] sm:$0xf] }
 0x108   :  { %v3169_v52 = vadd.f32 %v1477_v22, %v1449_v46  ;;  %1682 = vmatmul.bf16.gmra.mxu3 %v2977_v38  ;;  %1760 = vmatpush.bf16.msrb.mxu2 %v2430_v42  ;;  %v2321_v42 = vld [vmem:[#allocation5 + $0x278] sm:$0xf] }
 0x109   :  { %v3174_v6 = vadd.f32 %v3128_v31, %v1290_v19  ;;  %1730 = vmatpush.bf16.msrb.mxu1 %v2346_v39  ;;  %v2526_v19 = vor.u32 %v2758_v28, %v2525_v51  ;;  %v1365_v51 = vadd.f32 %v3104_v37, %v1336_v60  ;;  %v1338_v37 = vadd.f32 %v3086_v24, %v3121_v58  ;;  %v2704_v60 = vld [vmem:[#allocation5 + $0x268] sm:$0xf0] }
 0x10b   :  { %v1451_v29 = vpop.f32.mrf.mxu3  ;;  %1789 = vmatpush.bf16.msra.mxu3 %v2526_v19  ;;  %v1367_v24 = vadd.f32 %v3118_v54, %v1338_v37 }
 0x10c   :  { %v1452_v9 = vadd.f32 %v1451_v29, %v3151_v50 }
 0x10d   :  { %1731 = vmatpush.bf16.msrb.mxu1 %v2334_v47 }
 0x10e   :  { %v1419_v23 = vpop.f32.mrf.mxu2  ;;  %v1388_v57 = vpop.f32.mrf.mxu1 }
 0x10f   :  { %v1480_v31 = vpop.f32.mrf.mxu0  ;;  %v1389_v46 = vadd.f32 %v1388_v57, %v1360_v13  ;;  %v2707_v57 = vld [vmem:[#allocation5 + $0x280] sm:$0xf0] }
 0x110   :  { %v3179_v38 = vadd.f32 %v1480_v31, %v1452_v9  ;;  %v2755_v9 = vld [vmem:[#allocation5 + $0x400] sm:$0xf0] }
 0x111   :  { %v1418_v59 = vadd.f32 %v1417_v2, %v1389_v46  ;;  %2591 = vmatmul.msk.bf16.vlgmr.msra.gmra.mxu1 %vm1221_vm0, %v3001_v62  ;;  %1711 = vmatmul.bf16.gmra.mxu0 %v2957_v7  ;;  %v2731_v2 = vld [vmem:[#allocation5 + $0x340] sm:$0xf0]  ;;  %v2514_v39 = vor.u32 %v2755_v9, %v2513_v35  ;;  %v2322_v46 = vor.u32 %v2707_v57, %v2321_v42 }
 0x112   :  { %v2418_v7 = vor.u32 %v2731_v2, %v2417_v34 }
 0x113   :  { %1653 = vmatmul.bf16.gmra.mxu2 %v2955_v4  ;;  %1843 = vst [vmem:[#allocation8] sm:$0xff] %v1418_v59  ;;  %v1453_v22 = vpop.f32.mrf.mxu3  ;;  %1790 = vmatpush.bf16.msra.mxu3 %v2514_v39  ;;  %v2728_v59 = vld [vmem:[#allocation5 + $0x328] sm:$0xf0] }
 0x114   :  { %v1454_v63 = vadd.f32 %v1453_v22, %v3151_v50  ;;  %1761 = vmatpush.bf16.msrb.mxu2 %v2418_v7  ;;  %v2406_v36 = vor.u32 %v2728_v59, %v2405_v30  ;;  %1732 = vmatpush.bf16.msrb.mxu1 %v2322_v46  ;;  %v2701_v46 = vld [vmem:[#allocation5 + $0x250] sm:$0xf0] }
 0x116   :  { %v1422_v29 = vpop.f32.mrf.mxu2  ;;  %v1390_v0 = vpop.f32.mrf.mxu1 }
 0x117   :  { %v1482_v55 = vpop.f32.mrf.mxu0  ;;  %v1391_v4 = vadd.f32 %v1390_v0, %v1362_v41  ;;  %v2393_v41 = vld [vmem:[#allocation5 + $0x308] sm:$0xf] }
 0x118   :  { %v3189_v49 = vadd.f32 %v1482_v55, %v1454_v63  ;;  %1687 = vmatmul.bf16.gmra.mxu3 %v2989_v17  ;;  %1762 = vmatpush.bf16.msrb.mxu2 %v2406_v36  ;;  %v2725_v63 = vld [vmem:[#allocation5 + $0x310] sm:$0xf0]  ;;  %v2489_v0 = vld [vmem:[#allocation5 + $0x3c8] sm:$0xf] }
 0x119   :  { %v1420_v13 = vadd.f32 %v1419_v23, %v1391_v4  ;;  %v2752_v23 = vld [vmem:[#allocation5 + $0x3e8] sm:$0xf0]  ;;  %v2394_v47 = vor.u32 %v2725_v63, %v2393_v41  ;;  %v2749_v55 = vld [vmem:[#allocation5 + $0x3d0] sm:$0xf0]  ;;  %v2309_v4 = vld [vmem:[#allocation5 + $0x260] sm:$0xf] }
 0x11a   :  { %v2502_v14 = vor.u32 %v2752_v23, %v2501_v26  ;;  %v2490_v7 = vor.u32 %v2749_v55, %v2489_v0  ;;  %v2310_v35 = vor.u32 %v2704_v60, %v2309_v4  ;;  %v1348_v0 = vadd.f32 %v3138_v1, %v3174_v6 }
 0x11b   :  { %1846 = vst [vmem:[#allocation8 + $0x18] sm:$0xff] %v1420_v13  ;;  %v1456_v31 = vpop.f32.mrf.mxu3 }
 0x11c   :  { %v1457_v22 = vadd.f32 %v1456_v31, %v3151_v50  ;;  %1791 = vmatpush.bf16.msra.mxu3 %v2502_v14  ;;  %1763 = vmatpush.bf16.msrb.mxu2 %v2394_v47  ;;  %v2297_v31 = vld [vmem:[#allocation5 + $0x248] sm:$0xf] }
 0x11d   :  { %1733 = vmatpush.bf16.msrb.mxu1 %v2310_v35  ;;  %v2298_v54 = vor.u32 %v2701_v46, %v2297_v31 }
 0x11e   :  { %v1424_v28 = vpop.f32.mrf.mxu2  ;;  %v1393_v17 = vpop.f32.mrf.mxu1 }
 0x11f   :  { %v1485_v19 = vpop.f32.mrf.mxu0  ;;  %v1394_v11 = vadd.f32 %v1393_v17, %v1365_v51 }
 0x120   :  { %v3196_v34 = vadd.f32 %v1485_v19, %v1457_v22  ;;  %1792 = vmatpush.bf16.msra.mxu3 %v2490_v7 }
 0x121   :  { %v1423_v2 = vadd.f32 %v1422_v29, %v1394_v11  ;;  %2592 = vmatmul.msk.bf16.gmra.mxu1 %vm1221_vm0, %v3010_v33  ;;  %1716 = vmatmul.bf16.gmra.mxu0 %v2969_v56 }
 0x122   :  { %1734 = vmatpush.bf16.msrb.mxu1 %v2298_v54  ;;  %v3433_v54 = vld [vmem:[#allocation20_spill] sm:$0xff] }
 0x123   :  { %1658 = vmatmul.bf16.gmra.mxu2 %v2941_v18  ;;  %1849 = vst [vmem:[#allocation8 + $0x30] sm:$0xff] %v1423_v2  ;;  %v1458_v13 = vpop.f32.mrf.mxu3  ;;  %v1341_v18 = vadd.f32 %v3098_v10, %v3133_v45  ;;  %v1343_v10 = vadd.f32 %v3112_v43, %v3147_v44  ;;  %v1346_v43 = vadd.f32 %v3124_v27, %v3161_v48 }
 0x124   :  { %v1459_v29 = vadd.f32 %v1458_v13, %v3151_v50  ;;  %v1377_v27 = vadd.f32 %v3155_v20, %v1348_v0  ;;  %v3429_v20 = vld [vmem:[#allocation15_spill] sm:$0xff] }
 0x125   :  { %v1370_v59 = vadd.f32 %v3130_v8, %v1341_v18  ;;  %v1372_v45 = vadd.f32 %v3144_v21, %v1343_v10  ;;  %v3431_v18 = vld [vmem:[#allocation13_spill] sm:$0xff] }
 0x126   :  { %v1427_v58 = vpop.f32.mrf.mxu2  ;;  %v1395_v9 = vpop.f32.mrf.mxu1 }
 0x127   :  { %v1487_v39 = vpop.f32.mrf.mxu0  ;;  %v1396_v56 = vadd.f32 %v1395_v9, %v1367_v24 }
 0x128   :  { %v3206_v42 = vadd.f32 %v1487_v39, %v1459_v29  ;;  %1692 = vmatmul.bf16.gmra.mxu3 %v2999_v61 }
 0x129   :  { %v1425_v57 = vadd.f32 %v1424_v28, %v1396_v56 }
 0x12b   :  { %1852 = vst [vmem:[#allocation8 + $0x48] sm:$0xff] %v1425_v57  ;;  %v1461_v30 = vpop.f32.mrf.mxu3 }
 0x12c   :  { %v1462_v22 = vadd.f32 %v1461_v30, %v3151_v50 }
 0x12e   :  { %v1429_v51 = vpop.f32.mrf.mxu2  ;;  %v1398_v36 = vpop.f32.mrf.mxu1 }
 0x12f   :  { %v1490_v26 = vpop.f32.mrf.mxu0  ;;  %v1399_v23 = vadd.f32 %v1398_v36, %v1370_v59 }
 0x130   :  { %v3213_v17 = vadd.f32 %v1490_v26, %v1462_v22  ;;  %v3434_v26 = vld [vmem:[#allocation14_spill] sm:$0xff] }
 0x131   :  { %v1428_v61 = vadd.f32 %v1427_v58, %v1399_v23  ;;  %2593 = vmatmul.msk.bf16.gmra.mxu1 %vm1221_vm0, %v3019_v15  ;;  %1721 = vmatmul.bf16.gmra.mxu0 %v2981_v40  ;;  %v1375_v40 = vadd.f32 %v3142_v16, %v1346_v43 }
 0x133   :  { %1663 = vmatmul.bf16.gmra.mxu2 %v2953_v3  ;;  %1855 = vst [vmem:[#allocation8 + $0x60] sm:$0xff] %v1428_v61  ;;  %v1463_v8 = vpop.f32.mrf.mxu3 }
 0x134   :  { %v1464_v19 = vadd.f32 %v1463_v8, %v3151_v50 }
 0x136   :  { %v1432_v28 = vpop.f32.mrf.mxu2  ;;  %v1400_v14 = vpop.f32.mrf.mxu1 }
 0x137   :  { %v1492_v11 = vpop.f32.mrf.mxu0  ;;  %v1401_v41 = vadd.f32 %v1400_v14, %v1372_v45 }
 0x138   :  { %v3223_v63 = vadd.f32 %v1492_v11, %v1464_v19  ;;  %1793 = vmatmul.bf16.vlgmr.msra.gmra.mxu3 %v3008_v32 }
 0x139   :  { %v1430_v44 = vadd.f32 %v1429_v51, %v1401_v41  ;;  %v3436_v41 = vld [vmem:[#allocation16_spill] sm:$0xff] }
 0x13b   :  { %1858 = vst [vmem:[#allocation8 + $0x78] sm:$0xff] %v1430_v44  ;;  %v3228_v3 = vpop.f32.mrf.mxu3 }
 0x13e   :  { %v1434_v21 = vpop.f32.mrf.mxu2  ;;  %v1403_v47 = vpop.f32.mrf.mxu1 }
 0x13f   :  { %v3231_v37 = vpop.f32.mrf.mxu0  ;;  %v1404_v50 = vadd.f32 %v1403_v47, %v1375_v40 }
 0x141   :  { %v1433_v2 = vadd.f32 %v1432_v28, %v1404_v50  ;;  %2594 = vmatmul.msk.bf16.gmra.mxu1 %vm1221_vm0, %v3032_v5  ;;  %2595 = vmatmul.msk.bf16.vlgmr.msrb.gmra.mxu0 %vm1221_vm0, %v3001_v62 }
 0x143   :  { %1764 = vmatmul.bf16.vlgmr.msrb.gmra.mxu2 %v2967_v53  ;;  %1861 = vst [vmem:[#allocation8 + $0x90] sm:$0xff] %v1433_v2  ;;  %v3240_v32 = vpop.f32.mrf.mxu3  ;;  %v3428_v53 = vld [vmem:[#allocation12_spill] sm:$0xff] }
 0x146   :  { %v1533_v16 = vpop.f32.mrf.mxu2  ;;  %v1405_v48 = vpop.f32.mrf.mxu1 }
 0x147   :  { %v3243_v55 = vpop.f32.mrf.mxu0  ;;  %v1406_v7 = vadd.f32 %v1405_v48, %v1377_v27 }
 0x148   :  { %1798 = vmatmul.bf16.gmra.mxu3 %v3017_v12  ;;  %v3430_v12 = vld [vmem:[#allocation19_spill] sm:$0xff] }
 0x149   :  { %v1435_v4 = vadd.f32 %v1434_v21, %v1406_v7 }
 0x14b   :  { %1864 = vst [vmem:[#allocation8 + $0xa8] sm:$0xff] %v1435_v4  ;;  %v3246_v1 = vpop.f32.mrf.mxu3 }
 0x14e   :  { %v1535_v6 = vpop.f32.mrf.mxu2  ;;  %v1504_v62 = vpop.f32.mrf.mxu1 }
 0x14f   :  { %v3248_v60 = vpop.f32.mrf.mxu0  ;;  %v1505_v11 = vadd.f32 %v1504_v62, %v3158_v25 }
 0x151   :  { %1735 = vmatmul.bf16.vlgmr.msrb.gmra.mxu1 %v3428_v53  ;;  %2596 = vmatmul.msk.bf16.gmra.mxu0 %vm1221_vm0, %v3010_v33  ;;  %v3432_v33 = vld [vmem:[#allocation17_spill] sm:$0xff]  ;;  %v1534_v44 = vadd.f32 %v1533_v16, %v1505_v11 }
 0x153   :  { %1769 = vmatmul.bf16.gmra.mxu2 %v3429_v20  ;;  %v3254_v13 = vpop.f32.mrf.mxu3  ;;  %v1563_v50 = vadd.f32 %v3228_v3, %v1534_v44 }
 0x155   :  { %v1592_v27 = vadd.f32 %v3231_v37, %v1563_v50 }
 0x156   :  { %v1538_v35 = vpop.f32.mrf.mxu2  ;;  %v1506_v24 = vpop.f32.mrf.mxu1 }
 0x157   :  { %v3256_v58 = vpop.f32.mrf.mxu0  ;;  %v1507_v47 = vadd.f32 %v1506_v24, %v3169_v52 }
 0x158   :  { %1803 = vmatmul.bf16.gmra.mxu3 %v3430_v12 }
 0x159   :  { %v1536_v0 = vadd.f32 %v1535_v6, %v1507_v47 }
 0x15b   :  { %v3259_v29 = vpop.f32.mrf.mxu3  ;;  %v1565_v62 = vadd.f32 %v3240_v32, %v1536_v0 }
 0x15d   :  { %v1594_v3 = vadd.f32 %v3243_v55, %v1565_v62 }
 0x15e   :  { %v1540_v9 = vpop.f32.mrf.mxu2  ;;  %v1509_v39 = vpop.f32.mrf.mxu1 }
 0x15f   :  { %v3261_v56 = vpop.f32.mrf.mxu0  ;;  %v1510_v4 = vadd.f32 %v1509_v39, %v3179_v38 }
 0x161   :  { %1740 = vmatmul.bf16.gmra.mxu1 %v3431_v18  ;;  %2597 = vmatmul.msk.bf16.gmra.mxu0 %vm1221_vm0, %v3019_v15  ;;  %v3435_v15 = vld [vmem:[#allocation18_spill] sm:$0xff]  ;;  %v1539_v52 = vadd.f32 %v1538_v35, %v1510_v4 }
 0x163   :  { %1774 = vmatmul.bf16.gmra.mxu2 %v3432_v33  ;;  %v3267_v57 = vpop.f32.mrf.mxu3  ;;  %v1568_v18 = vadd.f32 %v3246_v1, %v1539_v52 }
 0x165   :  { %v1597_v32 = vadd.f32 %v3248_v60, %v1568_v18 }
 0x166   :  { %v1543_v31 = vpop.f32.mrf.mxu2  ;;  %v1511_v46 = vpop.f32.mrf.mxu1 }
 0x167   :  { %v3269_v30 = vpop.f32.mrf.mxu0  ;;  %v1512_v12 = vadd.f32 %v1511_v46, %v3189_v49 }
 0x168   :  { %1808 = vmatmul.bf16.gmra.mxu3 %v3433_v54 }
 0x169   :  { %v1541_v39 = vadd.f32 %v1540_v9, %v1512_v12 }
 0x16b   :  { %v3272_v59 = vpop.f32.mrf.mxu3 }
 0x16e   :  { %v3274_v51 = vpop.f32.mrf.mxu2  ;;  %v1514_v22 = vpop.f32.mrf.mxu1 }
 0x16f   :  { %v3276_v36 = vpop.f32.mrf.mxu0 }
 0x171   :  { %1745 = vmatmul.bf16.gmra.mxu1 %v3434_v26  ;;  %2598 = vmatmul.msk.bf16.gmra.mxu0 %vm1221_vm0, %v3032_v5  ;;  %v1515_v26 = vadd.f32 %v1514_v22, %v3196_v34 }
 0x173   :  { %1779 = vmatmul.bf16.gmra.mxu2 %v3435_v15  ;;  %v3282_v23 = vpop.f32.mrf.mxu3  ;;  %v1570_v15 = vadd.f32 %v3254_v13, %v1541_v39  ;;  %v1544_v49 = vadd.f32 %v1543_v31, %v1515_v26 }
 0x175   :  { %v1599_v46 = vadd.f32 %v3256_v58, %v1570_v15  ;;  %v1573_v47 = vadd.f32 %v3259_v29, %v1544_v49 }
 0x176   :  { %v3284_v10 = vpop.f32.mrf.mxu2  ;;  %v1516_v61 = vpop.f32.mrf.mxu1 }
 0x177   :  { %v3286_v8 = vpop.f32.mrf.mxu0  ;;  %v1517_v44 = vadd.f32 %v1516_v61, %v3206_v42  ;;  %v1602_v13 = vadd.f32 %v3261_v56, %v1573_v47 }
 0x179   :  { %v1546_v34 = vadd.f32 %v3274_v51, %v1517_v44 }
 0x17b   :  { %v3288_v45 = vpop.f32.mrf.mxu3 }
 0x17e   :  { %v3290_v28 = vpop.f32.mrf.mxu2  ;;  %v1519_v19 = vpop.f32.mrf.mxu1 }
 0x17f   :  { %v3292_v14 = vpop.f32.mrf.mxu0  ;;  %v1520_v0 = vadd.f32 %v1519_v19, %v3213_v17 }
 0x181   :  { %1750 = vmatmul.bf16.gmra.mxu1 %v3436_v41  ;;  %v1549_v42 = vadd.f32 %v3284_v10, %v1520_v0 }
 0x183   :  { %v3296_v5 = vpop.f32.mrf.mxu3  ;;  %v1578_v4 = vadd.f32 %v3272_v59, %v1549_v42 }
 0x185   :  { %v1607_v19 = vadd.f32 %v3276_v36, %v1578_v4 }
 0x186   :  { %v3298_v43 = vpop.f32.mrf.mxu2  ;;  %v1521_v40 = vpop.f32.mrf.mxu1 }
 0x187   :  { %v3300_v21 = vpop.f32.mrf.mxu0 }
 0x18b   :  { %v3304_v2 = vpop.f32.mrf.mxu3 }
 0x18e   :  { %v3307_v25 = vpop.f32.mrf.mxu2  ;;  %v1620_v48 = vpop.f32.mrf.mxu1 }
 0x18f   :  { %v3309_v7 = vpop.f32.mrf.mxu0  ;;  %v1621_v16 = vadd.f32 %v1620_v48, %v1592_v27  ;;  %v1575_v27 = vadd.f32 %v3267_v57, %v1546_v34 }
 0x191   :  { %1844 = vst [vmem:[#allocation8 + $0x8] sm:$0xff] %v1621_v16  ;;  %v1604_v29 = vadd.f32 %v3269_v30, %v1575_v27  ;;  %v1522_v16 = vadd.f32 %v1521_v40, %v3223_v63 }
 0x193   :  { %v3313_v53 = vpop.f32.mrf.mxu3  ;;  %v1551_v57 = vadd.f32 %v3290_v28, %v1522_v16 }
 0x195   :  { %v1580_v63 = vadd.f32 %v3282_v23, %v1551_v57 }
 0x196   :  { %v3316_v20 = vpop.f32.mrf.mxu2  ;;  %v1622_v6 = vpop.f32.mrf.mxu1 }
 0x197   :  { %v3318_v37 = vpop.f32.mrf.mxu0  ;;  %v1623_v24 = vadd.f32 %v1622_v6, %v1594_v3  ;;  %v3437_v3 = vld [vmem:[#allocation21_spill] sm:$0xff] }
 0x198   :  { %v3365_v6 = vperm.slane %v3437_v3, 2 }
 0x199   :  { %1847 = vst [vmem:[#allocation8 + $0x20] sm:$0xff] %v1623_v24  ;;  %v1609_v24 = vadd.f32 %v3286_v8, %v1580_v63 }
 0x19a   :  { %v1650_v59 = vadd.f32 %v3298_v43, %v3365_v6 }
 0x19b   :  { %v3322_v38 = vpop.f32.mrf.mxu3 }
 0x19c   :  { %v1679_v39 = vadd.f32 %v3288_v45, %v1650_v59  ;;  %v1655_v45 = vadd.f32 %v3316_v20, %v3365_v6 }
 0x19e   :  { %v3325_v33 = vpop.f32.mrf.mxu2  ;;  %v1625_v35 = vpop.f32.mrf.mxu1  ;;  %v1684_v34 = vadd.f32 %v3304_v2, %v1655_v45 }
 0x19f   :  { %v3327_v55 = vpop.f32.mrf.mxu0  ;;  %v1626_v54 = vadd.f32 %v1625_v35, %v1597_v32  ;;  %v1708_v32 = vadd.f32 %v3292_v14, %v1679_v39  ;;  %v1652_v35 = vadd.f32 %v3307_v25, %v3365_v6  ;;  %v1657_v0 = vadd.f32 %v3325_v33, %v3365_v6 }
 0x1a1   :  { %1850 = vst [vmem:[#allocation8 + $0x38] sm:$0xff] %v1626_v54  ;;  %v1681_v43 = vadd.f32 %v3296_v5, %v1652_v35  ;;  %v1713_v5 = vadd.f32 %v3309_v7, %v1684_v34 }
 0x1a3   :  { %v3334_v9 = vpop.f32.mrf.mxu3 }
 0x1a6   :  { %v3332_v1 = vpop.f32.mrf.mxu2  ;;  %v1627_v11 = vpop.f32.mrf.mxu1 }
 0x1a7   :  { %v1628_v60 = vadd.f32 %v1627_v11, %v1599_v46  ;;  %v3336_v41 = vpop.f32.mrf.mxu0  ;;  %v1710_v11 = vadd.f32 %v3300_v21, %v1681_v43  ;;  %v1660_v57 = vadd.f32 %v3332_v1, %v3365_v6 }
 0x1a9   :  { %1853 = vst [vmem:[#allocation8 + $0x50] sm:$0xff] %v1628_v60 }
 0x1ab   :  { %v3344_v50 = vpop.f32.mrf.mxu3 }
 0x1ae   :  { %v3342_v31 = vpop.f32.mrf.mxu2  ;;  %v1630_v58 = vpop.f32.mrf.mxu1 }
 0x1af   :  { %v1631_v22 = vadd.f32 %v1630_v58, %v1602_v13  ;;  %v3348_v48 = vpop.f32.mrf.mxu0  ;;  %v1662_v59 = vadd.f32 %v3342_v31, %v3365_v6 }
 0x1b1   :  { %1856 = vst [vmem:[#allocation8 + $0x68] sm:$0xff] %v1631_v22 }
 0x1b3   :  { %v3356_v62 = vpop.f32.mrf.mxu3 }
 0x1b6   :  { %v3352_v51 = vpop.f32.mrf.mxu2  ;;  %v1632_v56 = vpop.f32.mrf.mxu1 }
 0x1b7   :  { %v1633_v61 = vadd.f32 %v1632_v56, %v1604_v29  ;;  %v3358_v17 = vpop.f32.mrf.mxu0  ;;  %v1686_v29 = vadd.f32 %v3313_v53, %v1657_v0 }
 0x1b9   :  { %1859 = vst [vmem:[#allocation8 + $0x80] sm:$0xff] %v1633_v61  ;;  %v1715_v2 = vadd.f32 %v3318_v37, %v1686_v29 }
 0x1bb   :  { %v1794_v40 = vpop.f32.mrf.mxu3 }
 0x1be   :  { %v3362_v10 = vpop.f32.mrf.mxu2  ;;  %v1635_v30 = vpop.f32.mrf.mxu1 }
 0x1bf   :  { %v1636_v52 = vadd.f32 %v1635_v30, %v1607_v19  ;;  %v1823_v18 = vpop.f32.mrf.mxu0  ;;  %v1689_v30 = vadd.f32 %v3322_v38, %v1660_v57  ;;  %v1667_v43 = vadd.f32 %v3362_v10, %v3365_v6 }
 0x1c1   :  { %1862 = vst [vmem:[#allocation8 + $0x98] sm:$0xff] %v1636_v52  ;;  %v1718_v53 = vadd.f32 %v3327_v55, %v1689_v30  ;;  %v1696_v45 = vadd.f32 %v3356_v62, %v1667_v43 }
 0x1c3   :  { %v1796_v26 = vpop.f32.mrf.mxu3 }
 0x1c6   :  { %v1765_v12 = vpop.f32.mrf.mxu2  ;;  %v1637_v28 = vpop.f32.mrf.mxu1 }
 0x1c7   :  { %v1638_v36 = vadd.f32 %v1637_v28, %v1609_v24  ;;  %v1825_v49 = vpop.f32.mrf.mxu0  ;;  %v1691_v28 = vadd.f32 %v3334_v9, %v1662_v59 }
 0x1c9   :  { %1865 = vst [vmem:[#allocation8 + $0xb0] sm:$0xff] %v1638_v36  ;;  %v1720_v38 = vadd.f32 %v3336_v41, %v1691_v28 }
 0x1cb   :  { %v1799_v25 = vpop.f32.mrf.mxu3 }
 0x1ce   :  { %v1767_v54 = vpop.f32.mrf.mxu2  ;;  %v1736_v23 = vpop.f32.mrf.mxu1 }
 0x1cf   :  { %v1737_v15 = vadd.f32 %v1736_v23, %v1708_v32  ;;  %v1828_v58 = vpop.f32.mrf.mxu0  ;;  %v1665_v32 = vadd.f32 %v3352_v51, %v3365_v6 }
 0x1d1   :  { %v1766_v8 = vadd.f32 %v1765_v12, %v1737_v15 }
 0x1d3   :  { %v1795_v46 = vadd.f32 %v1794_v40, %v1766_v8  ;;  %v1801_v61 = vpop.f32.mrf.mxu3 }
 0x1d5   :  { %v1824_v60 = vadd.f32 %v1823_v18, %v1795_v46 }
 0x1d6   :  { %v1738_v44 = vpop.f32.mrf.mxu1  ;;  %v1770_v14 = vpop.f32.mrf.mxu2 }
 0x1d7   :  { %1845 = vst [vmem:[#allocation8 + $0x10] sm:$0xff] %v1824_v60  ;;  %v1739_v47 = vadd.f32 %v1738_v44, %v1710_v11  ;;  %v1830_v4 = vpop.f32.mrf.mxu0 }
 0x1d9   :  { %v1768_v13 = vadd.f32 %v1767_v54, %v1739_v47 }
 0x1db   :  { %v1797_v22 = vadd.f32 %v1796_v26, %v1768_v13  ;;  %v1804_v40 = vpop.f32.mrf.mxu3  ;;  %v1694_v26 = vadd.f32 %v3344_v50, %v1665_v32  ;;  %v1725_v50 = vadd.f32 %v3358_v17, %v1696_v45 }
 0x1dd   :  { %v1826_v21 = vadd.f32 %v1825_v49, %v1797_v22  ;;  %v1723_v9 = vadd.f32 %v3348_v48, %v1694_v26 }
 0x1de   :  { %v1741_v27 = vpop.f32.mrf.mxu1  ;;  %v1772_v42 = vpop.f32.mrf.mxu2 }
 0x1df   :  { %1848 = vst [vmem:[#allocation8 + $0x28] sm:$0xff] %v1826_v21  ;;  %v1742_v20 = vadd.f32 %v1741_v27, %v1713_v5  ;;  %v1833_v37 = vpop.f32.mrf.mxu0 }
 0x1e1   :  { %v1771_v56 = vadd.f32 %v1770_v14, %v1742_v20 }
 0x1e3   :  { %v1800_v16 = vadd.f32 %v1799_v25, %v1771_v56  ;;  %v1806_v55 = vpop.f32.mrf.mxu3 }
 0x1e5   :  { %v1829_v7 = vadd.f32 %v1828_v58, %v1800_v16 }
 0x1e6   :  { %v1743_v19 = vpop.f32.mrf.mxu1  ;;  %v1775_v3 = vpop.f32.mrf.mxu2 }
 0x1e7   :  { %1851 = vst [vmem:[#allocation8 + $0x40] sm:$0xff] %v1829_v7  ;;  %v1744_v33 = vadd.f32 %v1743_v19, %v1715_v2  ;;  %v1835_v23 = vpop.f32.mrf.mxu0 }
 0x1e9   :  { %v1773_v52 = vadd.f32 %v1772_v42, %v1744_v33 }
 0x1eb   :  { %v1802_v63 = vadd.f32 %v1801_v61, %v1773_v52  ;;  %v1809_v11 = vpop.f32.mrf.mxu3 }
 0x1ed   :  { %v1831_v24 = vadd.f32 %v1830_v4, %v1802_v63 }
 0x1ee   :  { %v1746_v12 = vpop.f32.mrf.mxu1  ;;  %v1777_v39 = vpop.f32.mrf.mxu2 }
 0x1ef   :  { %1854 = vst [vmem:[#allocation8 + $0x58] sm:$0xff] %v1831_v24  ;;  %v1747_v1 = vadd.f32 %v1746_v12, %v1718_v53  ;;  %v1838_v44 = vpop.f32.mrf.mxu0 }
 0x1f1   :  { %v1776_v18 = vadd.f32 %v1775_v3, %v1747_v1 }
 0x1f3   :  { %v1805_v36 = vadd.f32 %v1804_v40, %v1776_v18  ;;  %v1811_v10 = vpop.f32.mrf.mxu3 }
 0x1f5   :  { %v1834_v35 = vadd.f32 %v1833_v37, %v1805_v36 }
 0x1f6   :  { %v1748_v54 = vpop.f32.mrf.mxu1  ;;  %v1780_v41 = vpop.f32.mrf.mxu2 }
 0x1f7   :  { %1857 = vst [vmem:[#allocation8 + $0x70] sm:$0xff] %v1834_v35  ;;  %v1749_v31 = vadd.f32 %v1748_v54, %v1720_v38  ;;  %v1840_v62 = vpop.f32.mrf.mxu0 }
 0x1f9   :  { %v1778_v15 = vadd.f32 %v1777_v39, %v1749_v31 }
 0x1fb   :  { %v1807_v49 = vadd.f32 %v1806_v55, %v1778_v15 }
 0x1fd   :  { %v1836_v8 = vadd.f32 %v1835_v23, %v1807_v49 }
 0x1fe   :  { %v1751_v46 = vpop.f32.mrf.mxu1  ;;  %v1782_v34 = vpop.f32.mrf.mxu2 }
 0x1ff   :  { %1860 = vst [vmem:[#allocation8 + $0x88] sm:$0xff] %v1836_v8  ;;  %v1752_v51 = vadd.f32 %v1751_v46, %v1723_v9 }
 0x201   :  { %v1781_v60 = vadd.f32 %v1780_v41, %v1752_v51 }
 0x203   :  { %v1810_v14 = vadd.f32 %v1809_v11, %v1781_v60 }
 0x205   :  { %v1839_v47 = vadd.f32 %v1838_v44, %v1810_v14 }
 0x206   :  { %v1753_v25 = vpop.f32.mrf.mxu1 }
 0x207   :  { %1863 = vst [vmem:[#allocation8 + $0xa0] sm:$0xff] %v1839_v47  ;;  %v1754_v48 = vadd.f32 %v1753_v25, %v1725_v50 }
 0x209   :  { %v1783_v13 = vadd.f32 %v1782_v34, %v1754_v48 }
 0x20b   :  { %v1812_v6 = vadd.f32 %v1811_v10, %v1783_v13 }
 0x20d   :  { %v1841_v58 = vadd.f32 %v1840_v62, %v1812_v6 }
 0x20f   :  { %1866 = vst [vmem:[#allocation8 + $0xb8] sm:$0xff] %v1841_v58 }
 0x210   :  { %1879 = dma.vmem_to_hbm [thread:$0]  %s1872_s2, 3072, %s1874_s5, [#allocation4], %s2910_s6, %s2910_s6, %s2911_s7  }
 0x211   :  { %2900 = dma.done.wait [#allocation4], 3072  }
 0x212   :  { %2901 = vsyncadd [#allocation4], 4294964224 }
 0x213   :  { %1884 = vsyncpa [#allocation3], 1 }
 0x214   :  { %1885 = vsyncpa [#allocation6], 1 }
 0x215   :  { %1886 = vsyncpa [#allocation4], 1 }

</bundles_post_ra>
